<compile_context>
chip_gen: v7x
topology: tpu7x:2x2x1
jax: 0.10.0
libtpu: 0.0.40
codegen_flags: <defaults>
</compile_context>

<pallas_src>
import functools

import jax
import jax.numpy as jnp
from jax.experimental import pallas as pl
from jax.experimental.pallas import tpu as pltpu

N = 12        # number of neurons (module default)
N_PAD = 128   # lane-padded size
TB = 8        # timesteps per grid step (one sublane tile)

# packed-parameter row indices
(ROW_E_L, ROW_TAU_M, ROW_G, ROW_R_I, ROW_F_V, ROW_F_I, ROW_DTS,
 ROW_B_S, ROW_A_V, ROW_B_V, ROW_THINF, ROW_DV, ROW_I_A) = range(13)
P_ROWS = 16   # pad param rows to a multiple of 8

# packed-state row indices
ROW_V, ROW_THS, ROW_THV, ROW_IADD = range(4)
S_ROWS = 8

PARAM_ORDER = ["E_L", "tau_m", "G", "R_I", "f_v", "f_I", "delta_theta_s",
               "b_s", "a_v", "b_v", "theta_inf", "delta_V", "I_A"]
# lane-pad values that keep padded-lane state identically zero (and finite)
PARAM_PAD = {"E_L": 0.0, "tau_m": 1.0, "G": 1.0, "R_I": 1.0, "f_v": 1.0,
             "f_I": 1.0, "delta_theta_s": 0.0, "b_s": 1.0, "a_v": 1.0,
             "b_v": 1.0, "theta_inf": 0.0, "delta_V": 0.0, "I_A": 0.0}


# ----------------------------------------------------------------------------
# Pallas kernel: TB GLIF timesteps per grid iteration, state carried in the
# VMEM-resident final-state output block.
# ----------------------------------------------------------------------------
def glif_seq_kernel(x_ref, w_ref, p_ref, s0_ref, spk_ref, sfin_ref, *, n_steps):
    # Initialize the resident state block from the packed initial state once.
    @pl.when(pl.program_id(0) == 0)
    def _():
        sfin_ref[...] = s0_ref[...]

    w = w_ref[...]                                   # (128,128), loaded once

    # static row slices of the packed parameter tile (free)
    E_L   = p_ref[ROW_E_L:ROW_E_L + 1, :]
    tau_m = p_ref[ROW_TAU_M:ROW_TAU_M + 1, :]
    G     = p_ref[ROW_G:ROW_G + 1, :]
    R_I   = p_ref[ROW_R_I:ROW_R_I + 1, :]
    f_v   = p_ref[ROW_F_V:ROW_F_V + 1, :]
    f_I   = p_ref[ROW_F_I:ROW_F_I + 1, :]
    dts   = p_ref[ROW_DTS:ROW_DTS + 1, :]
    b_s   = p_ref[ROW_B_S:ROW_B_S + 1, :]
    a_v   = p_ref[ROW_A_V:ROW_A_V + 1, :]
    b_v   = p_ref[ROW_B_V:ROW_B_V + 1, :]
    thinf = p_ref[ROW_THINF:ROW_THINF + 1, :]
    dV    = p_ref[ROW_DV:ROW_DV + 1, :]
    I_A   = p_ref[ROW_I_A:ROW_I_A + 1, :]

    state = sfin_ref[...]                            # (8,128) resident state
    v    = state[ROW_V:ROW_V + 1, :]
    ths  = state[ROW_THS:ROW_THS + 1, :]
    thv  = state[ROW_THV:ROW_THV + 1, :]
    iadd = state[ROW_IADD:ROW_IADD + 1, :]

    step0 = pl.program_id(0) * TB
    spk_rows = []
    for t in range(TB):                              # static unroll, one tile
        x_t = x_ref[t:t + 1, :]                      # (1,128) static slice
        # recurrent drive: I_additive @ (mask * w) on the MXU + external drive
        I = jnp.dot(iadd, w, preferred_element_type=jnp.float32) + 0.85 * x_t

        dv = (I * R_I - G * (v - E_L)) / tau_m
        v_next = v + dv

        thr = ths + thv
        spiked_soft = jax.nn.sigmoid(v_next - thr)   # returned "spiked"
        spiked = (v_next >= thr).astype(jnp.float32)
        not_spiked = 1.0 - spiked

        v_reset = E_L + f_v * (v - E_L) - dV
        v_new = spiked * v_reset + not_spiked * v_next

        ths_new = (1.0 - b_s) * ths + spiked * dts
        d_thv = a_v * (v_new - E_L) - b_v * (thv - thinf)
        thv_new = thv + not_spiked * d_thv
        iadd_new = (1.0 - f_I) * iadd + spiked_soft * I_A

        # mask padded trailing timesteps (only when T % TB != 0)
        valid = (step0 + t) < n_steps
        v    = jnp.where(valid, v_new, v)
        ths  = jnp.where(valid, ths_new, ths)
        thv  = jnp.where(valid, thv_new, thv)
        iadd = jnp.where(valid, iadd_new, iadd)
        spk_rows.append(spiked_soft)

    # one full-tile (8,128) unmasked store for the spikes of this block
    spk_ref[...] = jnp.concatenate(spk_rows, axis=0)
    # one full-tile store back into the resident state block
    sfin_ref[...] = jnp.concatenate([v, ths, thv, iadd, state[4:S_ROWS, :]],
                                    axis=0)


# ----------------------------------------------------------------------------
# Wrapper: pack operands, run the fused-sequence pallas_call, unpack
# ----------------------------------------------------------------------------
def _pad_row(vec, pad_val):
    out = jnp.full((N_PAD,), pad_val, dtype=jnp.float32)
    return out.at[:N].set(vec.astype(jnp.float32))


@jax.jit
def glif_forward_sequence(xs, masked_w, state, params):
    """Run T GLIF forward steps in one fused Pallas kernel.

    xs:       (T, N) external input, one row per timestep
    masked_w: (N, N) self_recurrence_mask * w
    state:    dict with v, theta_s, theta_v, I_additive (each (N,))
    params:   dict with the 13 per-neuron parameter vectors (each (N,))
    returns:  (spiked_seq (T, N), final_state dict)
    """
    T = xs.shape[0]
    T_pad = ((T + TB - 1) // TB) * TB

    # pack / pad operands
    xs_p = jnp.zeros((T_pad, N_PAD), jnp.float32).at[:T, :N].set(
        xs.astype(jnp.float32))
    w_p = jnp.zeros((N_PAD, N_PAD), jnp.float32).at[:N, :N].set(
        masked_w.astype(jnp.float32))

    p_rows = [_pad_row(params[name], PARAM_PAD[name]) for name in PARAM_ORDER]
    p_rows += [jnp.zeros((N_PAD,), jnp.float32)] * (P_ROWS - len(p_rows))
    p_packed = jnp.stack(p_rows, axis=0)                       # (16, 128)

    s_rows = [_pad_row(state["v"], 0.0), _pad_row(state["theta_s"], 0.0),
              _pad_row(state["theta_v"], 0.0), _pad_row(state["I_additive"], 0.0)]
    s_rows += [jnp.zeros((N_PAD,), jnp.float32)] * (S_ROWS - len(s_rows))
    s0_packed = jnp.stack(s_rows, axis=0)                      # (8, 128)

    kernel = functools.partial(glif_seq_kernel, n_steps=T)

    spikes_p, sfin = pl.pallas_call(
        kernel,
        out_shape=(jax.ShapeDtypeStruct((T_pad, N_PAD), jnp.float32),
                   jax.ShapeDtypeStruct((S_ROWS, N_PAD), jnp.float32)),
        grid_spec=pltpu.PrefetchScalarGridSpec(
            num_scalar_prefetch=0,
            grid=(T_pad // TB,),
            in_specs=[
                pl.BlockSpec((TB, N_PAD), lambda i: (i, 0)),       # x(t) stream
                pl.BlockSpec((N_PAD, N_PAD), lambda i: (0, 0)),    # weight, once
                pl.BlockSpec((P_ROWS, N_PAD), lambda i: (0, 0)),   # params, once
                pl.BlockSpec((S_ROWS, N_PAD), lambda i: (0, 0)),   # init state
            ],
            out_specs=[
                pl.BlockSpec((TB, N_PAD), lambda i: (i, 0)),       # spikes out
                pl.BlockSpec((S_ROWS, N_PAD), lambda i: (0, 0)),   # final state
            ],
        ),
        compiler_params=pltpu.CompilerParams(
            dimension_semantics=("arbitrary",)),   # sequential state carry
    )(xs_p, w_p, p_packed, s0_packed)

    spiked_seq = spikes_p[:T, :N]
    new_state = {"v": sfin[ROW_V, :N], "theta_s": sfin[ROW_THS, :N],
                 "theta_v": sfin[ROW_THV, :N], "I_additive": sfin[ROW_IADD, :N]}
    return spiked_seq, new_state


# ----------------------------------------------------------------------------
# Pure-JAX reference (mirrors the PyTorch forward, scanned over time)
# ----------------------------------------------------------------------------
def glif_reference_sequence(xs, masked_w, state, params):
    def step(carry, x):
        v, ths, thv, iadd = carry
        I = iadd @ masked_w + 0.85 * x
        dv = (I * params["R_I"] - params["G"] * (v - params["E_L"])) / params["tau_m"]
        v_next = v + dv
        thr = ths + thv
        spiked_soft = jax.nn.sigmoid(v_next - thr)
        spiked = (v_next >= thr).astype(jnp.float32)
        not_spiked = (spiked - 1.0) / -1.0
        v_reset = params["E_L"] + params["f_v"] * (v - params["E_L"]) - params["delta_V"]
        v_new = spiked * v_reset + not_spiked * v_next
        ths_new = (1.0 - params["b_s"]) * ths + spiked * params["delta_theta_s"]
        d_thv = params["a_v"] * (v_new - params["E_L"]) - params["b_v"] * (thv - params["theta_inf"])
        thv_new = thv + not_spiked * d_thv
        iadd_new = (1.0 - params["f_I"]) * iadd + spiked_soft * params["I_A"]
        return (v_new, ths_new, thv_new, iadd_new), spiked_soft

    carry0 = (state["v"], state["theta_s"], state["theta_v"], state["I_additive"])
    (v, ths, thv, iadd), spikes = jax.lax.scan(step, carry0, xs)
    return spikes, {"v": v, "theta_s": ths, "theta_v": thv, "I_additive": iadd}


# ----------------------------------------------------------------------------
# Deterministic parameter / state construction (mirrors __init__)
# ----------------------------------------------------------------------------
def build_module(key, n=N, w_mean=0.2, w_var=0.15, neuron_types=(1, -1)):
    intervals = {
        "E_L": (-62.0, -46.0), "tau_m": (1.2, 2.5), "G": (0.7, 0.9),
        "R_I": (50.0, 60.0), "f_v": (0.25, 0.35), "f_I": (0.2, 0.6),
        "delta_theta_s": (10.0, 12.0), "b_s": (0.35, 0.45),
        "a_v": (0.45, 0.55), "b_v": (0.45, 0.55), "theta_inf": (-20.0, -16.0),
        "delta_V": (10.0, 12.0), "I_A": (1.2, 2.0),
    }
    clamps = {
        "E_L": (-75.0, -40.0), "tau_m": (1.1, 3.0), "G": (0.1, 0.95),
        "f_v": (0.01, 0.99), "f_I": (0.01, 0.99), "delta_theta_s": (6.0, 30.0),
        "b_s": (0.01, 0.9), "a_v": (0.01, 0.9), "b_v": (0.01, 0.9),
        "theta_inf": (-25.0, 0.0), "delta_V": (0.01, 35.0), "I_A": (0.5, 3.0),
        "R_I": (25.0, 64.0),
    }
    keys = jax.random.split(key, len(intervals) + 1)
    params = {}
    for k_rng, (name, (lo, hi)) in zip(keys[:-1], intervals.items()):
        v = jax.random.uniform(k_rng, (n,), jnp.float32, lo, hi)
        clo, chi = clamps[name]
        params[name] = jnp.clip(v, clo, chi)

    w = w_mean - w_var + 2.0 * w_var * jax.random.uniform(keys[-1], (n, n), jnp.float32)
    for i, t in enumerate(neuron_types):
        if t == 1:
            w = w.at[i, :].set(jnp.abs(w[i, :]))
        elif t == -1:
            w = w.at[i, :].set(-jnp.abs(w[i, :]))
    mask = jnp.ones((n, n), jnp.float32) - jnp.eye(n, dtype=jnp.float32)
    masked_w = mask * w

    state = {
        "v": params["E_L"] * jnp.ones((n,), jnp.float32),
        "theta_s": params["delta_theta_s"] * jnp.ones((n,), jnp.float32),
        "theta_v": jnp.ones((n,), jnp.float32),
        "I_additive": jnp.zeros((n,), jnp.float32),
    }
    return params, masked_w, state


if __name__ == "__main__":
    key = jax.random.PRNGKey(0)
    k_mod, k_x = jax.random.split(key)
    params, masked_w, state = build_module(k_mod)

    # sequence of external input currents, shape (T, N)
    T = 16
    xs = 2.0 * jax.random.normal(k_x, (T, N), jnp.float32)

    spikes, new_state = glif_forward_sequence(xs, masked_w, state, params)
    spikes = jax.block_until_ready(spikes)

    # validate against the pure-JAX reference of the PyTorch forward loop
    ref_spikes, ref_state = glif_reference_sequence(xs, masked_w, state, params)
    assert jnp.allclose(spikes, ref_spikes, atol=1e-4, rtol=1e-4), "spikes mismatch"
    for name in new_state:
        assert jnp.allclose(new_state[name], ref_state[name],
                            atol=1e-3, rtol=1e-4), name

    print("KERNEL_OK")
</pallas_src>

<mosaic_0001>
module attributes {stable_mosaic.version = 11 : i64} {
  func.func @glif_seq_kernel(%arg0: i32, %arg1: memref<8x128xf32, #tpu.memory_space<vmem>>, %arg2: memref<128x128xf32, #tpu.memory_space<vmem>>, %arg3: memref<16x128xf32, #tpu.memory_space<vmem>>, %arg4: memref<8x128xf32, #tpu.memory_space<vmem>>, %arg5: memref<8x128xf32, #tpu.memory_space<vmem>>, %arg6: memref<8x128xf32, #tpu.memory_space<vmem>>) attributes {dimension_semantics = [#tpu.dimension_semantics<arbitrary>], iteration_bounds = array<i64: 2>, scalar_prefetch = 0 : i64, scratch_operands = 0 : i64, tpu.core_type = #tpu.core_type<tc>, window_params = [{transform_indices = @transform_0, window_bounds = array<i64: 8, 128>}, {pipeline_mode = #tpu.pipeline_mode<synchronous>, transform_indices = @transform_1, window_bounds = array<i64: 128, 128>}, {pipeline_mode = #tpu.pipeline_mode<synchronous>, transform_indices = @transform_2, window_bounds = array<i64: 16, 128>}, {pipeline_mode = #tpu.pipeline_mode<synchronous>, transform_indices = @transform_3, window_bounds = array<i64: 8, 128>}, {transform_indices = @transform_4, window_bounds = array<i64: 8, 128>}, {pipeline_mode = #tpu.pipeline_mode<synchronous>, transform_indices = @transform_5, window_bounds = array<i64: 8, 128>}]} {
    %c0_i32 = arith.constant 0 : i32
    %0 = arith.cmpi eq, %arg0, %c0_i32 : i32
    %1 = arith.extui %0 : i1 to i32
    %c0_i32_0 = arith.constant 0 : i32
    %2 = arith.cmpi ne, %1, %c0_i32_0 : i32
    scf.if %2 {
      %c0_93 = arith.constant 0 : index
      %c0_94 = arith.constant 0 : index
      %452 = vector.load %arg4[%c0_93, %c0_94] : memref<8x128xf32, #tpu.memory_space<vmem>>, vector<8x128xf32>
      %c0_95 = arith.constant 0 : index
      %c0_96 = arith.constant 0 : index
      %453 = vector.load %arg6[%c0_95, %c0_96] : memref<8x128xf32, #tpu.memory_space<vmem>>, vector<8x128xf32>
      tpu.vector_store %arg6[%c0_95, %c0_96], %452 {strides = array<i32>} : memref<8x128xf32, #tpu.memory_space<vmem>>, vector<8x128xf32>,
    } else {
    }
    %c0 = arith.constant 0 : index
    %c0_1 = arith.constant 0 : index
    %3 = vector.load %arg2[%c0, %c0_1] : memref<128x128xf32, #tpu.memory_space<vmem>>, vector<128x128xf32>
    %c0_2 = arith.constant 0 : index
    %c0_3 = arith.constant 0 : index
    %4 = vector.load %arg3[%c0_2, %c0_3] : memref<16x128xf32, #tpu.memory_space<vmem>>, vector<1x128xf32>
    %c1 = arith.constant 1 : index
    %c0_4 = arith.constant 0 : index
    %5 = vector.load %arg3[%c1, %c0_4] : memref<16x128xf32, #tpu.memory_space<vmem>>, vector<1x128xf32>
    %c2 = arith.constant 2 : index
    %c0_5 = arith.constant 0 : index
    %6 = vector.load %arg3[%c2, %c0_5] : memref<16x128xf32, #tpu.memory_space<vmem>>, vector<1x128xf32>
    %c3 = arith.constant 3 : index
    %c0_6 = arith.constant 0 : index
    %7 = vector.load %arg3[%c3, %c0_6] : memref<16x128xf32, #tpu.memory_space<vmem>>, vector<1x128xf32>
    %c4 = arith.constant 4 : index
    %c0_7 = arith.constant 0 : index
    %8 = vector.load %arg3[%c4, %c0_7] : memref<16x128xf32, #tpu.memory_space<vmem>>, vector<1x128xf32>
    %c5 = arith.constant 5 : index
    %c0_8 = arith.constant 0 : index
    %9 = vector.load %arg3[%c5, %c0_8] : memref<16x128xf32, #tpu.memory_space<vmem>>, vector<1x128xf32>
    %c6 = arith.constant 6 : index
    %c0_9 = arith.constant 0 : index
    %10 = vector.load %arg3[%c6, %c0_9] : memref<16x128xf32, #tpu.memory_space<vmem>>, vector<1x128xf32>
    %c7 = arith.constant 7 : index
    %c0_10 = arith.constant 0 : index
    %11 = vector.load %arg3[%c7, %c0_10] : memref<16x128xf32, #tpu.memory_space<vmem>>, vector<1x128xf32>
    %c8 = arith.constant 8 : index
    %c0_11 = arith.constant 0 : index
    %12 = vector.load %arg3[%c8, %c0_11] : memref<16x128xf32, #tpu.memory_space<vmem>>, vector<1x128xf32>
    %c9 = arith.constant 9 : index
    %c0_12 = arith.constant 0 : index
    %13 = vector.load %arg3[%c9, %c0_12] : memref<16x128xf32, #tpu.memory_space<vmem>>, vector<1x128xf32>
    %c10 = arith.constant 10 : index
    %c0_13 = arith.constant 0 : index
    %14 = vector.load %arg3[%c10, %c0_13] : memref<16x128xf32, #tpu.memory_space<vmem>>, vector<1x128xf32>
    %c11 = arith.constant 11 : index
    %c0_14 = arith.constant 0 : index
    %15 = vector.load %arg3[%c11, %c0_14] : memref<16x128xf32, #tpu.memory_space<vmem>>, vector<1x128xf32>
    %c12 = arith.constant 12 : index
    %c0_15 = arith.constant 0 : index
    %16 = vector.load %arg3[%c12, %c0_15] : memref<16x128xf32, #tpu.memory_space<vmem>>, vector<1x128xf32>
    %c0_16 = arith.constant 0 : index
    %c0_17 = arith.constant 0 : index
    %17 = vector.load %arg6[%c0_16, %c0_17] : memref<8x128xf32, #tpu.memory_space<vmem>>, vector<8x128xf32>
    %18 = vector.extract_strided_slice %17 {offsets = [0, 0], sizes = [1, 128], strides = [1, 1]} : vector<8x128xf32> to vector<1x128xf32>
    %19 = vector.extract_strided_slice %17 {offsets = [1, 0], sizes = [1, 128], strides = [1, 1]} : vector<8x128xf32> to vector<1x128xf32>
    %20 = vector.extract_strided_slice %17 {offsets = [2, 0], sizes = [1, 128], strides = [1, 1]} : vector<8x128xf32> to vector<1x128xf32>
    %21 = vector.extract_strided_slice %17 {offsets = [3, 0], sizes = [1, 128], strides = [1, 1]} : vector<8x128xf32> to vector<1x128xf32>
    %c8_i32 = arith.constant 8 : i32
    %22 = arith.muli %arg0, %c8_i32 : i32
    %c0_18 = arith.constant 0 : index
    %c0_19 = arith.constant 0 : index
    %23 = vector.load %arg1[%c0_18, %c0_19] : memref<8x128xf32, #tpu.memory_space<vmem>>, vector<1x128xf32>
    %cst = arith.constant dense<0.000000e+00> : vector<1x128xf32>
    %24 = tpu.matmul %21, %3, %cst {dimension_numbers = #tpu.dot_dimension_numbers<[1], [0], [0], [1], [0, 0, 1, 1], [], []>} : vector<1x128xf32>, vector<128x128xf32>, vector<1x128xf32> -> vector<1x128xf32>
    %cst_20 = arith.constant 8.500000e-01 : f32
    %25 = vector.broadcast %cst_20 : f32 to vector<1x128xf32>
    %26 = arith.mulf %25, %23 : vector<1x128xf32>
    %27 = arith.addf %24, %26 : vector<1x128xf32>
    %28 = arith.mulf %27, %7 : vector<1x128xf32>
    %29 = arith.subf %18, %4 : vector<1x128xf32>
    %30 = arith.mulf %6, %29 : vector<1x128xf32>
    %31 = arith.subf %28, %30 : vector<1x128xf32>
    %32 = arith.divf %31, %5 : vector<1x128xf32>
    %33 = arith.addf %18, %32 : vector<1x128xf32>
    %34 = arith.addf %19, %20 : vector<1x128xf32>
    %35 = arith.subf %33, %34 : vector<1x128xf32>
    %36 = arith.negf %35 : vector<1x128xf32>
    %37 = math.exp %36 : vector<1x128xf32>
    %cst_21 = arith.constant 1.000000e+00 : f32
    %38 = vector.broadcast %cst_21 : f32 to vector<1x128xf32>
    %39 = arith.addf %38, %37 : vector<1x128xf32>
    %40 = arith.divf %38, %39 : vector<1x128xf32>
    %41 = arith.cmpf oge, %33, %34 : vector<1x128xf32>
    %42 = arith.extui %41 : vector<1x128xi1> to vector<1x128xi32>
    %43 = arith.sitofp %42 : vector<1x128xi32> to vector<1x128xf32>
    %cst_22 = arith.constant 1.000000e+00 : f32
    %44 = vector.broadcast %cst_22 : f32 to vector<1x128xf32>
    %45 = arith.subf %44, %43 : vector<1x128xf32>
    %46 = arith.subf %18, %4 : vector<1x128xf32>
    %47 = arith.mulf %8, %46 : vector<1x128xf32>
    %48 = arith.addf %4, %47 : vector<1x128xf32>
    %49 = arith.subf %48, %15 : vector<1x128xf32>
    %50 = arith.mulf %43, %49 : vector<1x128xf32>
    %51 = arith.mulf %45, %33 : vector<1x128xf32>
    %52 = arith.addf %50, %51 : vector<1x128xf32>
    %cst_23 = arith.constant 1.000000e+00 : f32
    %53 = vector.broadcast %cst_23 : f32 to vector<1x128xf32>
    %54 = arith.subf %53, %11 : vector<1x128xf32>
    %55 = arith.mulf %54, %19 : vector<1x128xf32>
    %56 = arith.mulf %43, %10 : vector<1x128xf32>
    %57 = arith.addf %55, %56 : vector<1x128xf32>
    %58 = arith.subf %52, %4 : vector<1x128xf32>
    %59 = arith.mulf %12, %58 : vector<1x128xf32>
    %60 = arith.subf %20, %14 : vector<1x128xf32>
    %61 = arith.mulf %13, %60 : vector<1x128xf32>
    %62 = arith.subf %59, %61 : vector<1x128xf32>
    %63 = arith.mulf %45, %62 : vector<1x128xf32>
    %64 = arith.addf %20, %63 : vector<1x128xf32>
    %cst_24 = arith.constant 1.000000e+00 : f32
    %65 = vector.broadcast %cst_24 : f32 to vector<1x128xf32>
    %66 = arith.subf %65, %9 : vector<1x128xf32>
    %67 = arith.mulf %66, %21 : vector<1x128xf32>
    %68 = arith.mulf %40, %16 : vector<1x128xf32>
    %69 = arith.addf %67, %68 : vector<1x128xf32>
    %c0_i32_25 = arith.constant 0 : i32
    %70 = arith.addi %22, %c0_i32_25 : i32
    %c16_i32 = arith.constant 16 : i32
    %71 = arith.cmpi slt, %70, %c16_i32 : i32
    %72 = arith.select %71, %52, %18 : vector<1x128xf32>
    %73 = arith.select %71, %57, %19 : vector<1x128xf32>
    %74 = arith.select %71, %64, %20 : vector<1x128xf32>
    %75 = arith.select %71, %69, %21 : vector<1x128xf32>
    %c1_26 = arith.constant 1 : index
    %c0_27 = arith.constant 0 : index
    %76 = vector.load %arg1[%c1_26, %c0_27] : memref<8x128xf32, #tpu.memory_space<vmem>>, vector<1x128xf32>
    %cst_28 = arith.constant dense<0.000000e+00> : vector<1x128xf32>
    %77 = tpu.matmul %75, %3, %cst_28 {dimension_numbers = #tpu.dot_dimension_numbers<[1], [0], [0], [1], [0, 0, 1, 1], [], []>} : vector<1x128xf32>, vector<128x128xf32>, vector<1x128xf32> -> vector<1x128xf32>
    %cst_29 = arith.constant 8.500000e-01 : f32
    %78 = vector.broadcast %cst_29 : f32 to vector<1x128xf32>
    %79 = arith.mulf %78, %76 : vector<1x128xf32>
    %80 = arith.addf %77, %79 : vector<1x128xf32>
    %81 = arith.mulf %80, %7 : vector<1x128xf32>
    %82 = arith.subf %72, %4 : vector<1x128xf32>
    %83 = arith.mulf %6, %82 : vector<1x128xf32>
    %84 = arith.subf %81, %83 : vector<1x128xf32>
    %85 = arith.divf %84, %5 : vector<1x128xf32>
    %86 = arith.addf %72, %85 : vector<1x128xf32>
    %87 = arith.addf %73, %74 : vector<1x128xf32>
    %88 = arith.subf %86, %87 : vector<1x128xf32>
    %89 = arith.negf %88 : vector<1x128xf32>
    %90 = math.exp %89 : vector<1x128xf32>
    %cst_30 = arith.constant 1.000000e+00 : f32
    %91 = vector.broadcast %cst_30 : f32 to vector<1x128xf32>
    %92 = arith.addf %91, %90 : vector<1x128xf32>
    %93 = arith.divf %91, %92 : vector<1x128xf32>
    %94 = arith.cmpf oge, %86, %87 : vector<1x128xf32>
    %95 = arith.extui %94 : vector<1x128xi1> to vector<1x128xi32>
    %96 = arith.sitofp %95 : vector<1x128xi32> to vector<1x128xf32>
    %cst_31 = arith.constant 1.000000e+00 : f32
    %97 = vector.broadcast %cst_31 : f32 to vector<1x128xf32>
    %98 = arith.subf %97, %96 : vector<1x128xf32>
    %99 = arith.subf %72, %4 : vector<1x128xf32>
    %100 = arith.mulf %8, %99 : vector<1x128xf32>
    %101 = arith.addf %4, %100 : vector<1x128xf32>
    %102 = arith.subf %101, %15 : vector<1x128xf32>
    %103 = arith.mulf %96, %102 : vector<1x128xf32>
    %104 = arith.mulf %98, %86 : vector<1x128xf32>
    %105 = arith.addf %103, %104 : vector<1x128xf32>
    %cst_32 = arith.constant 1.000000e+00 : f32
    %106 = vector.broadcast %cst_32 : f32 to vector<1x128xf32>
    %107 = arith.subf %106, %11 : vector<1x128xf32>
    %108 = arith.mulf %107, %73 : vector<1x128xf32>
    %109 = arith.mulf %96, %10 : vector<1x128xf32>
    %110 = arith.addf %108, %109 : vector<1x128xf32>
    %111 = arith.subf %105, %4 : vector<1x128xf32>
    %112 = arith.mulf %12, %111 : vector<1x128xf32>
    %113 = arith.subf %74, %14 : vector<1x128xf32>
    %114 = arith.mulf %13, %113 : vector<1x128xf32>
    %115 = arith.subf %112, %114 : vector<1x128xf32>
    %116 = arith.mulf %98, %115 : vector<1x128xf32>
    %117 = arith.addf %74, %116 : vector<1x128xf32>
    %cst_33 = arith.constant 1.000000e+00 : f32
    %118 = vector.broadcast %cst_33 : f32 to vector<1x128xf32>
    %119 = arith.subf %118, %9 : vector<1x128xf32>
    %120 = arith.mulf %119, %75 : vector<1x128xf32>
    %121 = arith.mulf %93, %16 : vector<1x128xf32>
    %122 = arith.addf %120, %121 : vector<1x128xf32>
    %c1_i32 = arith.constant 1 : i32
    %123 = arith.addi %22, %c1_i32 : i32
    %c16_i32_34 = arith.constant 16 : i32
    %124 = arith.cmpi slt, %123, %c16_i32_34 : i32
    %125 = arith.select %124, %105, %72 : vector<1x128xf32>
    %126 = arith.select %124, %110, %73 : vector<1x128xf32>
    %127 = arith.select %124, %117, %74 : vector<1x128xf32>
    %128 = arith.select %124, %122, %75 : vector<1x128xf32>
    %c2_35 = arith.constant 2 : index
    %c0_36 = arith.constant 0 : index
    %129 = vector.load %arg1[%c2_35, %c0_36] : memref<8x128xf32, #tpu.memory_space<vmem>>, vector<1x128xf32>
    %cst_37 = arith.constant dense<0.000000e+00> : vector<1x128xf32>
    %130 = tpu.matmul %128, %3, %cst_37 {dimension_numbers = #tpu.dot_dimension_numbers<[1], [0], [0], [1], [0, 0, 1, 1], [], []>} : vector<1x128xf32>, vector<128x128xf32>, vector<1x128xf32> -> vector<1x128xf32>
    %cst_38 = arith.constant 8.500000e-01 : f32
    %131 = vector.broadcast %cst_38 : f32 to vector<1x128xf32>
    %132 = arith.mulf %131, %129 : vector<1x128xf32>
    %133 = arith.addf %130, %132 : vector<1x128xf32>
    %134 = arith.mulf %133, %7 : vector<1x128xf32>
    %135 = arith.subf %125, %4 : vector<1x128xf32>
    %136 = arith.mulf %6, %135 : vector<1x128xf32>
    %137 = arith.subf %134, %136 : vector<1x128xf32>
    %138 = arith.divf %137, %5 : vector<1x128xf32>
    %139 = arith.addf %125, %138 : vector<1x128xf32>
    %140 = arith.addf %126, %127 : vector<1x128xf32>
    %141 = arith.subf %139, %140 : vector<1x128xf32>
    %142 = arith.negf %141 : vector<1x128xf32>
    %143 = math.exp %142 : vector<1x128xf32>
    %cst_39 = arith.constant 1.000000e+00 : f32
    %144 = vector.broadcast %cst_39 : f32 to vector<1x128xf32>
    %145 = arith.addf %144, %143 : vector<1x128xf32>
    %146 = arith.divf %144, %145 : vector<1x128xf32>
    %147 = arith.cmpf oge, %139, %140 : vector<1x128xf32>
    %148 = arith.extui %147 : vector<1x128xi1> to vector<1x128xi32>
    %149 = arith.sitofp %148 : vector<1x128xi32> to vector<1x128xf32>
    %cst_40 = arith.constant 1.000000e+00 : f32
    %150 = vector.broadcast %cst_40 : f32 to vector<1x128xf32>
    %151 = arith.subf %150, %149 : vector<1x128xf32>
    %152 = arith.subf %125, %4 : vector<1x128xf32>
    %153 = arith.mulf %8, %152 : vector<1x128xf32>
    %154 = arith.addf %4, %153 : vector<1x128xf32>
    %155 = arith.subf %154, %15 : vector<1x128xf32>
    %156 = arith.mulf %149, %155 : vector<1x128xf32>
    %157 = arith.mulf %151, %139 : vector<1x128xf32>
    %158 = arith.addf %156, %157 : vector<1x128xf32>
    %cst_41 = arith.constant 1.000000e+00 : f32
    %159 = vector.broadcast %cst_41 : f32 to vector<1x128xf32>
    %160 = arith.subf %159, %11 : vector<1x128xf32>
    %161 = arith.mulf %160, %126 : vector<1x128xf32>
    %162 = arith.mulf %149, %10 : vector<1x128xf32>
    %163 = arith.addf %161, %162 : vector<1x128xf32>
    %164 = arith.subf %158, %4 : vector<1x128xf32>
    %165 = arith.mulf %12, %164 : vector<1x128xf32>
    %166 = arith.subf %127, %14 : vector<1x128xf32>
    %167 = arith.mulf %13, %166 : vector<1x128xf32>
    %168 = arith.subf %165, %167 : vector<1x128xf32>
    %169 = arith.mulf %151, %168 : vector<1x128xf32>
    %170 = arith.addf %127, %169 : vector<1x128xf32>
    %cst_42 = arith.constant 1.000000e+00 : f32
    %171 = vector.broadcast %cst_42 : f32 to vector<1x128xf32>
    %172 = arith.subf %171, %9 : vector<1x128xf32>
    %173 = arith.mulf %172, %128 : vector<1x128xf32>
    %174 = arith.mulf %146, %16 : vector<1x128xf32>
    %175 = arith.addf %173, %174 : vector<1x128xf32>
    %c2_i32 = arith.constant 2 : i32
    %176 = arith.addi %22, %c2_i32 : i32
    %c16_i32_43 = arith.constant 16 : i32
    %177 = arith.cmpi slt, %176, %c16_i32_43 : i32
    %178 = arith.select %177, %158, %125 : vector<1x128xf32>
    %179 = arith.select %177, %163, %126 : vector<1x128xf32>
    %180 = arith.select %177, %170, %127 : vector<1x128xf32>
    %181 = arith.select %177, %175, %128 : vector<1x128xf32>
    %c3_44 = arith.constant 3 : index
    %c0_45 = arith.constant 0 : index
    %182 = vector.load %arg1[%c3_44, %c0_45] : memref<8x128xf32, #tpu.memory_space<vmem>>, vector<1x128xf32>
    %cst_46 = arith.constant dense<0.000000e+00> : vector<1x128xf32>
    %183 = tpu.matmul %181, %3, %cst_46 {dimension_numbers = #tpu.dot_dimension_numbers<[1], [0], [0], [1], [0, 0, 1, 1], [], []>} : vector<1x128xf32>, vector<128x128xf32>, vector<1x128xf32> -> vector<1x128xf32>
    %cst_47 = arith.constant 8.500000e-01 : f32
    %184 = vector.broadcast %cst_47 : f32 to vector<1x128xf32>
    %185 = arith.mulf %184, %182 : vector<1x128xf32>
    %186 = arith.addf %183, %185 : vector<1x128xf32>
    %187 = arith.mulf %186, %7 : vector<1x128xf32>
    %188 = arith.subf %178, %4 : vector<1x128xf32>
    %189 = arith.mulf %6, %188 : vector<1x128xf32>
    %190 = arith.subf %187, %189 : vector<1x128xf32>
    %191 = arith.divf %190, %5 : vector<1x128xf32>
    %192 = arith.addf %178, %191 : vector<1x128xf32>
    %193 = arith.addf %179, %180 : vector<1x128xf32>
    %194 = arith.subf %192, %193 : vector<1x128xf32>
    %195 = arith.negf %194 : vector<1x128xf32>
    %196 = math.exp %195 : vector<1x128xf32>
    %cst_48 = arith.constant 1.000000e+00 : f32
    %197 = vector.broadcast %cst_48 : f32 to vector<1x128xf32>
    %198 = arith.addf %197, %196 : vector<1x128xf32>
    %199 = arith.divf %197, %198 : vector<1x128xf32>
    %200 = arith.cmpf oge, %192, %193 : vector<1x128xf32>
    %201 = arith.extui %200 : vector<1x128xi1> to vector<1x128xi32>
    %202 = arith.sitofp %201 : vector<1x128xi32> to vector<1x128xf32>
    %cst_49 = arith.constant 1.000000e+00 : f32
    %203 = vector.broadcast %cst_49 : f32 to vector<1x128xf32>
    %204 = arith.subf %203, %202 : vector<1x128xf32>
    %205 = arith.subf %178, %4 : vector<1x128xf32>
    %206 = arith.mulf %8, %205 : vector<1x128xf32>
    %207 = arith.addf %4, %206 : vector<1x128xf32>
    %208 = arith.subf %207, %15 : vector<1x128xf32>
    %209 = arith.mulf %202, %208 : vector<1x128xf32>
    %210 = arith.mulf %204, %192 : vector<1x128xf32>
    %211 = arith.addf %209, %210 : vector<1x128xf32>
    %cst_50 = arith.constant 1.000000e+00 : f32
    %212 = vector.broadcast %cst_50 : f32 to vector<1x128xf32>
    %213 = arith.subf %212, %11 : vector<1x128xf32>
    %214 = arith.mulf %213, %179 : vector<1x128xf32>
    %215 = arith.mulf %202, %10 : vector<1x128xf32>
    %216 = arith.addf %214, %215 : vector<1x128xf32>
    %217 = arith.subf %211, %4 : vector<1x128xf32>
    %218 = arith.mulf %12, %217 : vector<1x128xf32>
    %219 = arith.subf %180, %14 : vector<1x128xf32>
    %220 = arith.mulf %13, %219 : vector<1x128xf32>
    %221 = arith.subf %218, %220 : vector<1x128xf32>
    %222 = arith.mulf %204, %221 : vector<1x128xf32>
    %223 = arith.addf %180, %222 : vector<1x128xf32>
    %cst_51 = arith.constant 1.000000e+00 : f32
    %224 = vector.broadcast %cst_51 : f32 to vector<1x128xf32>
    %225 = arith.subf %224, %9 : vector<1x128xf32>
    %226 = arith.mulf %225, %181 : vector<1x128xf32>
    %227 = arith.mulf %199, %16 : vector<1x128xf32>
    %228 = arith.addf %226, %227 : vector<1x128xf32>
    %c3_i32 = arith.constant 3 : i32
    %229 = arith.addi %22, %c3_i32 : i32
    %c16_i32_52 = arith.constant 16 : i32
    %230 = arith.cmpi slt, %229, %c16_i32_52 : i32
    %231 = arith.select %230, %211, %178 : vector<1x128xf32>
    %232 = arith.select %230, %216, %179 : vector<1x128xf32>
    %233 = arith.select %230, %223, %180 : vector<1x128xf32>
    %234 = arith.select %230, %228, %181 : vector<1x128xf32>
    %c4_53 = arith.constant 4 : index
    %c0_54 = arith.constant 0 : index
    %235 = vector.load %arg1[%c4_53, %c0_54] : memref<8x128xf32, #tpu.memory_space<vmem>>, vector<1x128xf32>
    %cst_55 = arith.constant dense<0.000000e+00> : vector<1x128xf32>
    %236 = tpu.matmul %234, %3, %cst_55 {dimension_numbers = #tpu.dot_dimension_numbers<[1], [0], [0], [1], [0, 0, 1, 1], [], []>} : vector<1x128xf32>, vector<128x128xf32>, vector<1x128xf32> -> vector<1x128xf32>
    %cst_56 = arith.constant 8.500000e-01 : f32
    %237 = vector.broadcast %cst_56 : f32 to vector<1x128xf32>
    %238 = arith.mulf %237, %235 : vector<1x128xf32>
    %239 = arith.addf %236, %238 : vector<1x128xf32>
    %240 = arith.mulf %239, %7 : vector<1x128xf32>
    %241 = arith.subf %231, %4 : vector<1x128xf32>
    %242 = arith.mulf %6, %241 : vector<1x128xf32>
    %243 = arith.subf %240, %242 : vector<1x128xf32>
    %244 = arith.divf %243, %5 : vector<1x128xf32>
    %245 = arith.addf %231, %244 : vector<1x128xf32>
    %246 = arith.addf %232, %233 : vector<1x128xf32>
    %247 = arith.subf %245, %246 : vector<1x128xf32>
    %248 = arith.negf %247 : vector<1x128xf32>
    %249 = math.exp %248 : vector<1x128xf32>
    %cst_57 = arith.constant 1.000000e+00 : f32
    %250 = vector.broadcast %cst_57 : f32 to vector<1x128xf32>
    %251 = arith.addf %250, %249 : vector<1x128xf32>
    %252 = arith.divf %250, %251 : vector<1x128xf32>
    %253 = arith.cmpf oge, %245, %246 : vector<1x128xf32>
    %254 = arith.extui %253 : vector<1x128xi1> to vector<1x128xi32>
    %255 = arith.sitofp %254 : vector<1x128xi32> to vector<1x128xf32>
    %cst_58 = arith.constant 1.000000e+00 : f32
    %256 = vector.broadcast %cst_58 : f32 to vector<1x128xf32>
    %257 = arith.subf %256, %255 : vector<1x128xf32>
    %258 = arith.subf %231, %4 : vector<1x128xf32>
    %259 = arith.mulf %8, %258 : vector<1x128xf32>
    %260 = arith.addf %4, %259 : vector<1x128xf32>
    %261 = arith.subf %260, %15 : vector<1x128xf32>
    %262 = arith.mulf %255, %261 : vector<1x128xf32>
    %263 = arith.mulf %257, %245 : vector<1x128xf32>
    %264 = arith.addf %262, %263 : vector<1x128xf32>
    %cst_59 = arith.constant 1.000000e+00 : f32
    %265 = vector.broadcast %cst_59 : f32 to vector<1x128xf32>
    %266 = arith.subf %265, %11 : vector<1x128xf32>
    %267 = arith.mulf %266, %232 : vector<1x128xf32>
    %268 = arith.mulf %255, %10 : vector<1x128xf32>
    %269 = arith.addf %267, %268 : vector<1x128xf32>
    %270 = arith.subf %264, %4 : vector<1x128xf32>
    %271 = arith.mulf %12, %270 : vector<1x128xf32>
    %272 = arith.subf %233, %14 : vector<1x128xf32>
    %273 = arith.mulf %13, %272 : vector<1x128xf32>
    %274 = arith.subf %271, %273 : vector<1x128xf32>
    %275 = arith.mulf %257, %274 : vector<1x128xf32>
    %276 = arith.addf %233, %275 : vector<1x128xf32>
    %cst_60 = arith.constant 1.000000e+00 : f32
    %277 = vector.broadcast %cst_60 : f32 to vector<1x128xf32>
    %278 = arith.subf %277, %9 : vector<1x128xf32>
    %279 = arith.mulf %278, %234 : vector<1x128xf32>
    %280 = arith.mulf %252, %16 : vector<1x128xf32>
    %281 = arith.addf %279, %280 : vector<1x128xf32>
    %c4_i32 = arith.constant 4 : i32
    %282 = arith.addi %22, %c4_i32 : i32
    %c16_i32_61 = arith.constant 16 : i32
    %283 = arith.cmpi slt, %282, %c16_i32_61 : i32
    %284 = arith.select %283, %264, %231 : vector<1x128xf32>
    %285 = arith.select %283, %269, %232 : vector<1x128xf32>
    %286 = arith.select %283, %276, %233 : vector<1x128xf32>
    %287 = arith.select %283, %281, %234 : vector<1x128xf32>
    %c5_62 = arith.constant 5 : index
    %c0_63 = arith.constant 0 : index
    %288 = vector.load %arg1[%c5_62, %c0_63] : memref<8x128xf32, #tpu.memory_space<vmem>>, vector<1x128xf32>
    %cst_64 = arith.constant dense<0.000000e+00> : vector<1x128xf32>
    %289 = tpu.matmul %287, %3, %cst_64 {dimension_numbers = #tpu.dot_dimension_numbers<[1], [0], [0], [1], [0, 0, 1, 1], [], []>} : vector<1x128xf32>, vector<128x128xf32>, vector<1x128xf32> -> vector<1x128xf32>
    %cst_65 = arith.constant 8.500000e-01 : f32
    %290 = vector.broadcast %cst_65 : f32 to vector<1x128xf32>
    %291 = arith.mulf %290, %288 : vector<1x128xf32>
    %292 = arith.addf %289, %291 : vector<1x128xf32>
    %293 = arith.mulf %292, %7 : vector<1x128xf32>
    %294 = arith.subf %284, %4 : vector<1x128xf32>
    %295 = arith.mulf %6, %294 : vector<1x128xf32>
    %296 = arith.subf %293, %295 : vector<1x128xf32>
    %297 = arith.divf %296, %5 : vector<1x128xf32>
    %298 = arith.addf %284, %297 : vector<1x128xf32>
    %299 = arith.addf %285, %286 : vector<1x128xf32>
    %300 = arith.subf %298, %299 : vector<1x128xf32>
    %301 = arith.negf %300 : vector<1x128xf32>
    %302 = math.exp %301 : vector<1x128xf32>
    %cst_66 = arith.constant 1.000000e+00 : f32
    %303 = vector.broadcast %cst_66 : f32 to vector<1x128xf32>
    %304 = arith.addf %303, %302 : vector<1x128xf32>
    %305 = arith.divf %303, %304 : vector<1x128xf32>
    %306 = arith.cmpf oge, %298, %299 : vector<1x128xf32>
    %307 = arith.extui %306 : vector<1x128xi1> to vector<1x128xi32>
    %308 = arith.sitofp %307 : vector<1x128xi32> to vector<1x128xf32>
    %cst_67 = arith.constant 1.000000e+00 : f32
    %309 = vector.broadcast %cst_67 : f32 to vector<1x128xf32>
    %310 = arith.subf %309, %308 : vector<1x128xf32>
    %311 = arith.subf %284, %4 : vector<1x128xf32>
    %312 = arith.mulf %8, %311 : vector<1x128xf32>
    %313 = arith.addf %4, %312 : vector<1x128xf32>
    %314 = arith.subf %313, %15 : vector<1x128xf32>
    %315 = arith.mulf %308, %314 : vector<1x128xf32>
    %316 = arith.mulf %310, %298 : vector<1x128xf32>
    %317 = arith.addf %315, %316 : vector<1x128xf32>
    %cst_68 = arith.constant 1.000000e+00 : f32
    %318 = vector.broadcast %cst_68 : f32 to vector<1x128xf32>
    %319 = arith.subf %318, %11 : vector<1x128xf32>
    %320 = arith.mulf %319, %285 : vector<1x128xf32>
    %321 = arith.mulf %308, %10 : vector<1x128xf32>
    %322 = arith.addf %320, %321 : vector<1x128xf32>
    %323 = arith.subf %317, %4 : vector<1x128xf32>
    %324 = arith.mulf %12, %323 : vector<1x128xf32>
    %325 = arith.subf %286, %14 : vector<1x128xf32>
    %326 = arith.mulf %13, %325 : vector<1x128xf32>
    %327 = arith.subf %324, %326 : vector<1x128xf32>
    %328 = arith.mulf %310, %327 : vector<1x128xf32>
    %329 = arith.addf %286, %328 : vector<1x128xf32>
    %cst_69 = arith.constant 1.000000e+00 : f32
    %330 = vector.broadcast %cst_69 : f32 to vector<1x128xf32>
    %331 = arith.subf %330, %9 : vector<1x128xf32>
    %332 = arith.mulf %331, %287 : vector<1x128xf32>
    %333 = arith.mulf %305, %16 : vector<1x128xf32>
    %334 = arith.addf %332, %333 : vector<1x128xf32>
    %c5_i32 = arith.constant 5 : i32
    %335 = arith.addi %22, %c5_i32 : i32
    %c16_i32_70 = arith.constant 16 : i32
    %336 = arith.cmpi slt, %335, %c16_i32_70 : i32
    %337 = arith.select %336, %317, %284 : vector<1x128xf32>
    %338 = arith.select %336, %322, %285 : vector<1x128xf32>
    %339 = arith.select %336, %329, %286 : vector<1x128xf32>
    %340 = arith.select %336, %334, %287 : vector<1x128xf32>
    %c6_71 = arith.constant 6 : index
    %c0_72 = arith.constant 0 : index
    %341 = vector.load %arg1[%c6_71, %c0_72] : memref<8x128xf32, #tpu.memory_space<vmem>>, vector<1x128xf32>
    %cst_73 = arith.constant dense<0.000000e+00> : vector<1x128xf32>
    %342 = tpu.matmul %340, %3, %cst_73 {dimension_numbers = #tpu.dot_dimension_numbers<[1], [0], [0], [1], [0, 0, 1, 1], [], []>} : vector<1x128xf32>, vector<128x128xf32>, vector<1x128xf32> -> vector<1x128xf32>
    %cst_74 = arith.constant 8.500000e-01 : f32
    %343 = vector.broadcast %cst_74 : f32 to vector<1x128xf32>
    %344 = arith.mulf %343, %341 : vector<1x128xf32>
    %345 = arith.addf %342, %344 : vector<1x128xf32>
    %346 = arith.mulf %345, %7 : vector<1x128xf32>
    %347 = arith.subf %337, %4 : vector<1x128xf32>
    %348 = arith.mulf %6, %347 : vector<1x128xf32>
    %349 = arith.subf %346, %348 : vector<1x128xf32>
    %350 = arith.divf %349, %5 : vector<1x128xf32>
    %351 = arith.addf %337, %350 : vector<1x128xf32>
    %352 = arith.addf %338, %339 : vector<1x128xf32>
    %353 = arith.subf %351, %352 : vector<1x128xf32>
    %354 = arith.negf %353 : vector<1x128xf32>
    %355 = math.exp %354 : vector<1x128xf32>
    %cst_75 = arith.constant 1.000000e+00 : f32
    %356 = vector.broadcast %cst_75 : f32 to vector<1x128xf32>
    %357 = arith.addf %356, %355 : vector<1x128xf32>
    %358 = arith.divf %356, %357 : vector<1x128xf32>
    %359 = arith.cmpf oge, %351, %352 : vector<1x128xf32>
    %360 = arith.extui %359 : vector<1x128xi1> to vector<1x128xi32>
    %361 = arith.sitofp %360 : vector<1x128xi32> to vector<1x128xf32>
    %cst_76 = arith.constant 1.000000e+00 : f32
    %362 = vector.broadcast %cst_76 : f32 to vector<1x128xf32>
    %363 = arith.subf %362, %361 : vector<1x128xf32>
    %364 = arith.subf %337, %4 : vector<1x128xf32>
    %365 = arith.mulf %8, %364 : vector<1x128xf32>
    %366 = arith.addf %4, %365 : vector<1x128xf32>
    %367 = arith.subf %366, %15 : vector<1x128xf32>
    %368 = arith.mulf %361, %367 : vector<1x128xf32>
    %369 = arith.mulf %363, %351 : vector<1x128xf32>
    %370 = arith.addf %368, %369 : vector<1x128xf32>
    %cst_77 = arith.constant 1.000000e+00 : f32
    %371 = vector.broadcast %cst_77 : f32 to vector<1x128xf32>
    %372 = arith.subf %371, %11 : vector<1x128xf32>
    %373 = arith.mulf %372, %338 : vector<1x128xf32>
    %374 = arith.mulf %361, %10 : vector<1x128xf32>
    %375 = arith.addf %373, %374 : vector<1x128xf32>
    %376 = arith.subf %370, %4 : vector<1x128xf32>
    %377 = arith.mulf %12, %376 : vector<1x128xf32>
    %378 = arith.subf %339, %14 : vector<1x128xf32>
    %379 = arith.mulf %13, %378 : vector<1x128xf32>
    %380 = arith.subf %377, %379 : vector<1x128xf32>
    %381 = arith.mulf %363, %380 : vector<1x128xf32>
    %382 = arith.addf %339, %381 : vector<1x128xf32>
    %cst_78 = arith.constant 1.000000e+00 : f32
    %383 = vector.broadcast %cst_78 : f32 to vector<1x128xf32>
    %384 = arith.subf %383, %9 : vector<1x128xf32>
    %385 = arith.mulf %384, %340 : vector<1x128xf32>
    %386 = arith.mulf %358, %16 : vector<1x128xf32>
    %387 = arith.addf %385, %386 : vector<1x128xf32>
    %c6_i32 = arith.constant 6 : i32
    %388 = arith.addi %22, %c6_i32 : i32
    %c16_i32_79 = arith.constant 16 : i32
    %389 = arith.cmpi slt, %388, %c16_i32_79 : i32
    %390 = arith.select %389, %370, %337 : vector<1x128xf32>
    %391 = arith.select %389, %375, %338 : vector<1x128xf32>
    %392 = arith.select %389, %382, %339 : vector<1x128xf32>
    %393 = arith.select %389, %387, %340 : vector<1x128xf32>
    %c7_80 = arith.constant 7 : index
    %c0_81 = arith.constant 0 : index
    %394 = vector.load %arg1[%c7_80, %c0_81] : memref<8x128xf32, #tpu.memory_space<vmem>>, vector<1x128xf32>
    %cst_82 = arith.constant dense<0.000000e+00> : vector<1x128xf32>
    %395 = tpu.matmul %393, %3, %cst_82 {dimension_numbers = #tpu.dot_dimension_numbers<[1], [0], [0], [1], [0, 0, 1, 1], [], []>} : vector<1x128xf32>, vector<128x128xf32>, vector<1x128xf32> -> vector<1x128xf32>
    %cst_83 = arith.constant 8.500000e-01 : f32
    %396 = vector.broadcast %cst_83 : f32 to vector<1x128xf32>
    %397 = arith.mulf %396, %394 : vector<1x128xf32>
    %398 = arith.addf %395, %397 : vector<1x128xf32>
    %399 = arith.mulf %398, %7 : vector<1x128xf32>
    %400 = arith.subf %390, %4 : vector<1x128xf32>
    %401 = arith.mulf %6, %400 : vector<1x128xf32>
    %402 = arith.subf %399, %401 : vector<1x128xf32>
    %403 = arith.divf %402, %5 : vector<1x128xf32>
    %404 = arith.addf %390, %403 : vector<1x128xf32>
    %405 = arith.addf %391, %392 : vector<1x128xf32>
    %406 = arith.subf %404, %405 : vector<1x128xf32>
    %407 = arith.negf %406 : vector<1x128xf32>
    %408 = math.exp %407 : vector<1x128xf32>
    %cst_84 = arith.constant 1.000000e+00 : f32
    %409 = vector.broadcast %cst_84 : f32 to vector<1x128xf32>
    %410 = arith.addf %409, %408 : vector<1x128xf32>
    %411 = arith.divf %409, %410 : vector<1x128xf32>
    %412 = arith.cmpf oge, %404, %405 : vector<1x128xf32>
    %413 = arith.extui %412 : vector<1x128xi1> to vector<1x128xi32>
    %414 = arith.sitofp %413 : vector<1x128xi32> to vector<1x128xf32>
    %cst_85 = arith.constant 1.000000e+00 : f32
    %415 = vector.broadcast %cst_85 : f32 to vector<1x128xf32>
    %416 = arith.subf %415, %414 : vector<1x128xf32>
    %417 = arith.subf %390, %4 : vector<1x128xf32>
    %418 = arith.mulf %8, %417 : vector<1x128xf32>
    %419 = arith.addf %4, %418 : vector<1x128xf32>
    %420 = arith.subf %419, %15 : vector<1x128xf32>
    %421 = arith.mulf %414, %420 : vector<1x128xf32>
    %422 = arith.mulf %416, %404 : vector<1x128xf32>
    %423 = arith.addf %421, %422 : vector<1x128xf32>
    %cst_86 = arith.constant 1.000000e+00 : f32
    %424 = vector.broadcast %cst_86 : f32 to vector<1x128xf32>
    %425 = arith.subf %424, %11 : vector<1x128xf32>
    %426 = arith.mulf %425, %391 : vector<1x128xf32>
    %427 = arith.mulf %414, %10 : vector<1x128xf32>
    %428 = arith.addf %426, %427 : vector<1x128xf32>
    %429 = arith.subf %423, %4 : vector<1x128xf32>
    %430 = arith.mulf %12, %429 : vector<1x128xf32>
    %431 = arith.subf %392, %14 : vector<1x128xf32>
    %432 = arith.mulf %13, %431 : vector<1x128xf32>
    %433 = arith.subf %430, %432 : vector<1x128xf32>
    %434 = arith.mulf %416, %433 : vector<1x128xf32>
    %435 = arith.addf %392, %434 : vector<1x128xf32>
    %cst_87 = arith.constant 1.000000e+00 : f32
    %436 = vector.broadcast %cst_87 : f32 to vector<1x128xf32>
    %437 = arith.subf %436, %9 : vector<1x128xf32>
    %438 = arith.mulf %437, %393 : vector<1x128xf32>
    %439 = arith.mulf %411, %16 : vector<1x128xf32>
    %440 = arith.addf %438, %439 : vector<1x128xf32>
    %c7_i32 = arith.constant 7 : i32
    %441 = arith.addi %22, %c7_i32 : i32
    %c16_i32_88 = arith.constant 16 : i32
    %442 = arith.cmpi slt, %441, %c16_i32_88 : i32
    %443 = arith.select %442, %423, %390 : vector<1x128xf32>
    %444 = arith.select %442, %428, %391 : vector<1x128xf32>
    %445 = arith.select %442, %435, %392 : vector<1x128xf32>
    %446 = arith.select %442, %440, %393 : vector<1x128xf32>
    %447 = tpu.concatenate %40, %93, %146, %199, %252, %305, %358, %411 in 0 : vector<1x128xf32>, vector<1x128xf32>, vector<1x128xf32>, vector<1x128xf32>, vector<1x128xf32>, vector<1x128xf32>, vector<1x128xf32>, vector<1x128xf32> -> vector<8x128xf32>
    %c0_89 = arith.constant 0 : index
    %c0_90 = arith.constant 0 : index
    %448 = vector.load %arg5[%c0_89, %c0_90] : memref<8x128xf32, #tpu.memory_space<vmem>>, vector<8x128xf32>
    tpu.vector_store %arg5[%c0_89, %c0_90], %447 {strides = array<i32>} : memref<8x128xf32, #tpu.memory_space<vmem>>, vector<8x128xf32>,
    %449 = vector.extract_strided_slice %17 {offsets = [4, 0], sizes = [4, 128], strides = [1, 1]} : vector<8x128xf32> to vector<4x128xf32>
    %450 = tpu.concatenate %443, %444, %445, %446, %449 in 0 : vector<1x128xf32>, vector<1x128xf32>, vector<1x128xf32>, vector<1x128xf32>, vector<4x128xf32> -> vector<8x128xf32>
    %c0_91 = arith.constant 0 : index
    %c0_92 = arith.constant 0 : index
    %451 = vector.load %arg6[%c0_91, %c0_92] : memref<8x128xf32, #tpu.memory_space<vmem>>, vector<8x128xf32>
    tpu.vector_store %arg6[%c0_91, %c0_92], %450 {strides = array<i32>} : memref<8x128xf32, #tpu.memory_space<vmem>>, vector<8x128xf32>,
    return
  }
  func.func @transform_0(%arg0: i32) -> (i32, i32) {
    %c0_i32 = arith.constant 0 : i32
    %c0_i32_0 = arith.constant 0 : i32
    return %arg0, %c0_i32 : i32, i32
  }
  func.func @transform_1(%arg0: i32) -> (i32, i32) {
    %c0_i32 = arith.constant 0 : i32
    %c0_i32_0 = arith.constant 0 : i32
    %c0_i32_1 = arith.constant 0 : i32
    return %c0_i32, %c0_i32_0 : i32, i32
  }
  func.func @transform_2(%arg0: i32) -> (i32, i32) {
    %c0_i32 = arith.constant 0 : i32
    %c0_i32_0 = arith.constant 0 : i32
    %c0_i32_1 = arith.constant 0 : i32
    return %c0_i32, %c0_i32_0 : i32, i32
  }
  func.func @transform_3(%arg0: i32) -> (i32, i32) {
    %c0_i32 = arith.constant 0 : i32
    %c0_i32_0 = arith.constant 0 : i32
    %c0_i32_1 = arith.constant 0 : i32
    return %c0_i32, %c0_i32_0 : i32, i32
  }
  func.func @transform_4(%arg0: i32) -> (i32, i32) {
    %c0_i32 = arith.constant 0 : i32
    %c0_i32_0 = arith.constant 0 : i32
    return %arg0, %c0_i32 : i32, i32
  }
  func.func @transform_5(%arg0: i32) -> (i32, i32) {
    %c0_i32 = arith.constant 0 : i32
    %c0_i32_0 = arith.constant 0 : i32
    %c0_i32_1 = arith.constant 0 : i32
    return %c0_i32, %c0_i32_0 : i32, i32
  }
}

</mosaic_0001>

<bundles_post_ra>
// kernel: glif_forward_sequence.1
= control target key start
LH: loop header
LB: loop body
LE: loop exit
PB: predicated region body
PF: predicated region fallthrough
CT: control target
= control target key end

     0   :  { %11 = vsyncpa [#allocation3], 0  ;;  %s2963_s0 = inlined_call_operand.vmem [shape: f32[16,128], index: 0, kind: input, shape index: {}]   ;;  %s2964_s1 = inlined_call_operand.vmem [shape: f32[128,128], index: 1, kind: input, shape index: {}]   ;;  %s2965_s2 = inlined_call_operand.vmem [shape: f32[16,128], index: 2, kind: input, shape index: {}]   ;;  %s2966_s3 = inlined_call_operand.vmem [shape: f32[8,128], index: 3, kind: input, shape index: {}]   ;;  %s2967_s4 = inlined_call_operand.hbm [shape: f32[16,128], index: 4, kind: output, shape index: {0}]   ;;  %s2968_s5 = inlined_call_operand.vmem [shape: f32[8,128], index: 5, kind: output, shape index: {1}]  }
   0x1   :  { %13 = vsyncpa [#allocation3 + $0x1], 0  ;;  %s2219_s18 = smov 0   ;;  %s2221_s19 = smov 0  }
   0x2   :  { %s2223_s20 = smov 0   ;;  %s2225_s21 = smov 0  }
   0x3 LB: > { %s2240_s22 = sadd.s32 4294967295, %s2183_s21   ;;  %s1407_s23 = sadd.s32 4294967294, %s2183_s21   ;;  %s2183_s21 = sphi %s2225_s21, %s2976_s21   ;;  %s2179_s20 = sphi %s2223_s20, %s2975_s20   ;;  %s2175_s19 = sphi %s2221_s19, %s2974_s19   ;;  %s2171_s18 = sphi %s2219_s18, %s2973_s18  }
   0x4   : > { %s2244_s24 = sadd.s32 1, %s2183_s21   ;;  %s115_s25 = sadd.s32 1, %s2179_s20 }
   0x5   : > { %s112_s26 = ssub.s32 %s2183_s21, %s2244_s24  ;;  %p125_p0 = scmp.ne.s32.totalorder %s2179_s20, %s2175_s19 }
   0x6   : > { %p113_p1 = scmp.eq.s32.totalorder %s112_s26, 0  ;;  %p126_p2 = scmp.eq.s32.totalorder %s2240_s22, 1 }
   0x7   : > { %p131_p3 = scmp.ne.s32.totalorder %s2175_s19, %s2171_s18  ;;  %p132_p4 = scmp.eq.s32.totalorder %s1407_s23, 1 }
   0x8   : > { %s2255_s27 = scalar_select %p113_p1, %s2179_s20, %s115_s25  }
   0x9   : > { %p2257_p5 = por %p126_p2, %p125_p0  ;;  %p2261_p6 = por %p132_p4, %p131_p3 }
   0xa   : > { %p1410_p7 = scmp.ge.s32.totalorder %s2183_s21, 1  ;;  %p187_p8 = scmp.lt.s32.totalorder %s2183_s21, 3 }
   0xc   : > { %p188_p9 = pnand %p1410_p7, %p187_p8 }
   0xd   : > { %s209_s30 = sand.u32 (!%p188_p9), 1, %s2175_s19   ;;  %p214_p10 = scmp.lt.s32.totalorder (!%p188_p9), %s2240_s22, 1 }
   0xe   : > { %191 = sbr.rel (%p188_p9) target bundleno = 2120 (0x848), region = 36  ;;  %s2271_s6 = sshll.u32 (!%p188_p9), %s209_s30, 3 }
   0xf   : > { %s211_s12 = scalar_lea.vmem (!%p188_p9), [#allocation2], %s2271_s6  ;;  %p1413_p11 = scmp.ne.s32.totalorder (!%p188_p9), %s2240_s22, 0 }
  0x15   : > { %s215_s7 = scalar_select %p214_p10, %s2240_s22, 1 }
  0x16   : > { %221 = sbr.rel (%p1413_p11) target bundleno = 29 (0x1d), region = 40  ;;  %v222_v0 = vld [vmem:[%s2966_s3] sm:$0xff] (!%p1413_p11) }
  0x17   : > { %s1412_s8 = sshll.u32 %s215_s7, 3  ;;  %223 = vst [vmem:[%s2968_s5] sm:$0xff] (!%p1413_p11), %v222_v0 }
  0x18   : > { %s2277_s11 = scalar_lea.vmem %s2963_s0, %s1412_s8 }
  0x1d PF: > { %v224_v1 = vld [vmem:[%s2964_s1] sm:$0xff]  ;;  %v225_v2 = vld [vmem:[%s2964_s1 + $0x8] sm:$0xff]  ;;  %v226_v3 = vld [vmem:[%s2964_s1 + $0x10] sm:$0xff]  ;;  %v2185_v4 = vmov 0.0|0.0   ;;  %vm2186_vm0 = vmmov 0   ;;  %v2187_v7 = vmov 0.0  }
  0x1e   : > { %1851 = vmatprep.subr.bf16.mxu0 %v2185_v4  ;;  %v2297_v5 = vpack.c.bf16 %v225_v2, %v224_v1  ;;  %v227_v6 = vld [vmem:[%s2964_s1 + $0x18] sm:$0xff]  ;;  %1603 = vmatprep.mubr.msk.f32.mxu0 %vm2186_vm0, %v2187_v7  ;;  %v228_v9 = vld [vmem:[%s2964_s1 + $0x20] sm:$0xff]  ;;  %v229_v10 = vld [vmem:[%s2964_s1 + $0x28] sm:$0xff]  ;;  %s2444_s13 = sshll.u32 %s2240_s22, 3  ;;  %vm1302_vm7 = vcmask 1040384   ;;  %vm1304_vm8 = vcmask 1041408  }
  0x1f   : > { %1875 = vmatprep.subr.bf16.mxu1 %v2185_v4  ;;  %1638 = vmatprep.mubr.msk.f32.mxu1 %vm2186_vm0, %v2187_v7  ;;  %v2308_v8 = vpack.c.bf16 %v227_v6, %v226_v3  ;;  %v2320_v11 = vpack.c.bf16 %v229_v10, %v228_v9  ;;  %v230_v12 = vld [vmem:[%s2964_s1 + $0x30] sm:$0xff]  ;;  %v231_v13 = vld [vmem:[%s2964_s1 + $0x38] sm:$0xff]  ;;  %v232_v15 = vld [vmem:[%s2964_s1 + $0x40] sm:$0xff]  ;;  %p384_p12 = scmp.lt.s32.totalorder %s2444_s13, 16  ;;  %s637_s8 = sadd.s32 2, %s2444_s13  ;;  %vm1306_vm11 = vcmask 1042432  }
  0x20   : > { %1853 = vmatpush3.bf16.msra.mxu0 %v2297_v5  ;;  %1877 = vmatpush3.bf16.msra.mxu1 %v2297_v5  ;;  %v2332_v14 = vpack.c.bf16 %v231_v13, %v230_v12  ;;  %v233_v16 = vld [vmem:[%s2964_s1 + $0x48] sm:$0xff]  ;;  %v234_v18 = vld [vmem:[%s2964_s1 + $0x50] sm:$0xff]  ;;  %v235_v19 = vld [vmem:[%s2964_s1 + $0x58] sm:$0xff]  ;;  %p638_p0 = scmp.lt.s32.totalorder %s637_s8, 16  ;;  %s764_s10 = sadd.s32 3, %s2444_s13  ;;  %vm1308_vm14 = vcmask 1043456  }
  0x21   : > { %1854 = vmatprep.subr.bf16.mxu0 %v2185_v4  ;;  %1878 = vmatprep.subr.bf16.mxu1 %v2185_v4  ;;  %v2344_v17 = vpack.c.bf16 %v233_v16, %v232_v15  ;;  %v2356_v20 = vpack.c.bf16 %v235_v19, %v234_v18  ;;  %v236_v21 = vld [vmem:[%s2964_s1 + $0x60] sm:$0xff]  ;;  %v237_v22 = vld [vmem:[%s2964_s1 + $0x68] sm:$0xff]  ;;  %v238_v24 = vld [vmem:[%s2964_s1 + $0x70] sm:$0xff]  ;;  %s385_s26 = scalar_select %p384_p12, 1, 0 }
  0x22   : > { %v2368_v23 = vpack.c.bf16 %v237_v22, %v236_v21  ;;  %v239_v25 = vld [vmem:[%s2964_s1 + $0x78] sm:$0xff]  ;;  %v2385_v27 = vld [vmem:[%s2968_s5] sm:$0xff]  ;;  %v250_v47 = vld [vmem:[%s2965_s2 + $0xa] sm:$0x1]  ;;  %s639_s9 = scalar_select %p638_p0, 1, 0 }
  0x23   : > { %v2380_v26 = vpack.c.bf16 %v239_v25, %v238_v24  ;;  %v2391_v28 = vrot.slane %v2385_v27, 3  ;;  %v241_v29 = vld [vmem:[%s2965_s2 + $0x1] sm:$0x1]  ;;  %v2422_v30 = vld [vmem:[%s2965_s2] sm:$0x1]  ;;  %v337_v36 = vrot.slane %v2385_v27, 1  ;;  %v386_v61 = vstv %s385_s26 }
  0x24   : > { %1856 = vmatpush3.bf16.msra.mxu0 %v2308_v8  ;;  %1880 = vmatpush3.bf16.msra.mxu1 %v2308_v8  ;;  %v255_v31 = vld [vmem:[%s2277_s11] sm:$0x1]  ;;  %2085 = vrcp.f32 %v241_v29  ;;  %v331_v33 = vsub.f32 %v2385_v27, %v2422_v30  ;;  %v2430_v34 = vld [vmem:[%s2965_s2 + $0x2] sm:$0x1]  ;;  %v2435_v35 = vld [vmem:[%s2965_s2 + $0x4] sm:$0x1] }
  0x25   : > { %1857 = vmatprep.subr.bf16.mxu0 %v2185_v4  ;;  %1881 = vmatprep.subr.bf16.mxu1 %v2185_v4  ;;  %v256_v32 = vmul.f32 0.85, %v255_v31  ;;  %v2441_v37 = vld [vmem:[%s2965_s2 + $0x3] sm:$0x1]  ;;  %v339_v44 = vadd.f32 %v337_v36, %v2385_v27  ;;  %v247_v45 = vld [vmem:[%s2965_s2 + $0x7] sm:$0x1] }
  0x26   : > { %v332_v40 = vmul.f32 %v331_v33, %v2430_v34  ;;  %v354_v41 = vmul.f32 %v331_v33, %v2435_v35  ;;  %v2463_v50 = vld [vmem:[%s2965_s2 + $0xb] sm:$0x1]  ;;  %v2465_v51 = vsub.f32 1.0, %v247_v45  ;;  %v2468_v54 = vrot.slane %v250_v47, 6  ;;  %v2475_v57 = vld [vmem:[%s2965_s2 + $0x6] sm:$0x1] }
  0x27   : > { %v341_v53 = vrot.slane %v339_v44, 1  ;;  %vm2482_vm2 = vcmp.eq.s32.totalorder %v386_v61, 1  ;;  %v2489_v12 = vld [vmem:[%s2965_s2 + $0x9] sm:$0x1]  ;;  %v2498_v16 = vld [vmem:[%s2965_s2 + $0x8] sm:$0x1] }
  0x28   : > { %1859 = vmatpush3.bf16.msra.mxu0 %v2320_v11  ;;  %1883 = vmatpush3.bf16.msra.mxu1 %v2320_v11  ;;  %v355_v49 = vadd.f32 %v354_v41, %v2422_v30  ;;  %v361_v58 = vmul.f32 %v2465_v51, %v337_v36  ;;  %v369_v60 = vsub.f32 %v2385_v27, %v2468_v54  ;;  %s510_s26 = sadd.s32 1, %s2444_s13  ;;  %p765_p1 = scmp.lt.s32.totalorder %s764_s10, 16 }
  0x29   : > { %1860 = vmatprep.subr.bf16.mxu0 %v2185_v4  ;;  %1884 = vmatprep.subr.bf16.mxu1 %v2185_v4  ;;  %p511_p13 = scmp.lt.s32.totalorder %s510_s26, 16  ;;  %s891_s15 = sadd.s32 4, %s2444_s13 }
  0x2a   : > { %v356_v56 = vsub.f32 %v355_v49, %v2463_v50  ;;  %v371_v10 = vrot.slane %v369_v60, 2  ;;  %s766_s14 = scalar_select %p765_p1, 1, 0 }
  0x2b   : > { %s512_s7 = scalar_select %p511_p13, 1, 0 }
  0x2c   : > { %1862 = vmatpush3.bf16.msra.mxu0 %v2332_v14  ;;  %1886 = vmatpush3.bf16.msra.mxu1 %v2332_v14  ;;  %v373_v19 = vmul.f32 %v371_v10, %v2489_v12  ;;  %p892_p2 = scmp.lt.s32.totalorder %s891_s15, 16  ;;  %s1018_s17 = sadd.s32 5, %s2444_s13 }
  0x2d   : > { %1863 = vmatprep.subr.bf16.mxu0 %v2185_v4  ;;  %1887 = vmatprep.subr.bf16.mxu1 %v2185_v4  ;;  %p1019_p3 = scmp.lt.s32.totalorder %s1018_s17, 16  ;;  %s1145_s25 = sadd.s32 6, %s2444_s13 }
  0x2e   : > { %v2454_v46 = vpop.eup %2085  ;;  %s893_s16 = scalar_select %p892_p2, 1, 0 }
  0x2f   : > { %s1020_s23 = scalar_select %p1019_p3, 1, 0 }
  0x30   : > { %1865 = vmatpush3.bf16.msra.mxu0 %v2344_v17  ;;  %1889 = vmatpush3.bf16.msra.mxu1 %v2344_v17  ;;  %p1146_p4 = scmp.lt.s32.totalorder %s1145_s25, 16  ;;  %s1342_s10 = sshll.u32 %s211_s12, 4  ;;  %s2908_s10 = int_to_ptr.vmem [resolvable:$true] %s1342_s10 }
  0x31   : > { %1866 = vmatprep.subr.bf16.mxu0 %v2185_v4  ;;  %1890 = vmatprep.subr.bf16.mxu1 %v2185_v4  ;;  %s2121_s17 = scalar_lea.vmem %s2908_s10, 128 }
  0x32   : > { %s1147_s26 = scalar_select %p1146_p4, 1, 0 }
  0x33   : > { %p2122_p8 = scmp.ne.s32.totalorder %s2908_s10, %s2121_s17 }
  0x34   : > { %1868 = vmatpush3.bf16.msra.mxu0 %v2356_v20  ;;  %1892 = vmatpush3.bf16.msra.mxu1 %v2356_v20 }
  0x35   : > { %1869 = vmatprep.subr.bf16.mxu0 %v2185_v4  ;;  %1893 = vmatprep.subr.bf16.mxu1 %v2185_v4  ;;  %p2123_p9 = pnand %p2122_p8, %p2257_p5 }
  0x37   : > { %p2124_p10 = pneg %p2123_p9 }
  0x38   : > { %1871 = vmatpush3.bf16.msra.mxu0 %v2368_v23  ;;  %1895 = vmatpush3.bf16.msra.mxu1 %v2368_v23 }
  0x39   : > { %1872 = vmatprep.subr.bf16.mxu0 %v2185_v4  ;;  %1896 = vmatprep.subr.bf16.mxu1 %v2185_v4 }
  0x3c   : > { %1874 = vmatpush3.bf16.msra.mxu0 %v2380_v26  ;;  %1898 = vmatpush3.bf16.msra.mxu1 %v2380_v26 }
  0x3d   : > { %1899 = vmatprep.subr.bf16.mxu0 %v2185_v4  ;;  %1923 = vmatprep.subr.bf16.mxu1 %v2185_v4 }
  0x3f   : > { %1604 = vmatmul.mubr.f32.vlgmr.msra.gmra.mrb[0].mxu0 %v2391_v28 }
  0x40   : > { %1901 = vmatpush3.bf16.msra.mxu0 %v2297_v5  ;;  %1673 = vmatprep.mubr.msk.f32.mxu0 %vm2186_vm0, %v2187_v7 }
  0x41   : > { %1902 = vmatprep.subr.bf16.mxu0 %v2185_v4 }
  0x44   : > { %1904 = vmatpush3.bf16.msra.mxu0 %v2308_v8 }
  0x45   : > { %1905 = vmatprep.subr.bf16.mxu0 %v2185_v4 }
  0x48   : > { %1907 = vmatpush3.bf16.msra.mxu0 %v2320_v11 }
  0x49   : > { %1908 = vmatprep.subr.bf16.mxu0 %v2185_v4 }
  0x4c   : > { %1910 = vmatpush3.bf16.msra.mxu0 %v2332_v14 }
  0x4d   : > { %1911 = vmatprep.subr.bf16.mxu0 %v2185_v4 }
  0x50   : > { %1913 = vmatpush3.bf16.msra.mxu0 %v2344_v17 }
  0x51   : > { %1914 = vmatprep.subr.bf16.mxu0 %v2185_v4 }
  0x54   : > { %1916 = vmatpush3.bf16.msra.mxu0 %v2356_v20 }
  0x55   : > { %1917 = vmatprep.subr.bf16.mxu0 %v2185_v4 }
  0x58   : > { %1919 = vmatpush3.bf16.msra.mxu0 %v2368_v23 }
  0x59   : > { %1920 = vmatprep.subr.bf16.mxu0 %v2185_v4 }
  0x5c   : > { %1922 = vmatpush3.bf16.msra.mxu0 %v2380_v26 }
  0x5d   : > { %1947 = vmatprep.subr.bf16.mxu0 %v2185_v4 }
 0x112   : > { %v326_v38 = vpop.f32.mrb[0].mxu0 }
 0x113   : > { %v327_v39 = vadd.f32 %v326_v38, %v256_v32  ;;  %v1605_v42 = vpop.f32.mrb[1].mxu0 }
 0x115   : > { %v330_v43 = vmul.f32 %v327_v39, %v2441_v37 }
 0x117   : > { %v333_v48 = vsub.f32 %v330_v43, %v332_v40  ;;  %v2522_v40 = vld [vmem:[%s2965_s2 + $0xc] sm:$0x1] }
 0x119   : > { %v335_v52 = vmul.f32 %v2454_v46, %v333_v48 }
 0x11b   : > { %v336_v55 = vadd.f32 %v335_v52, %v2385_v27 }
 0x11d   : > { %v343_v59 = vsub.f32 %v336_v55, %v341_v53  ;;  %vm350_vm1 = vcmp.ge.f32.partialorder %v336_v55, %v341_v53 }
 0x11e   : > { %v1416_v62 = vsel %vm350_vm1, 1.0, %v2187_v7  ;;  %vm1310_vm1 = vcmask 1044480  }
 0x11f   : > { %v1415_v63 = vmul.f32 -1.442695, %v343_v59  ;;  %v353_v0 = vsub.f32 1.0, %v1416_v62  ;;  %v357_v1 = vmul.f32 %v1416_v62, %v356_v56  ;;  %v362_v2 = vmul.f32 %v1416_v62, %v2475_v57 }
 0x121   : > { %2087 = vpow2.f32 %v1415_v63  ;;  %v358_v6 = vmul.f32 %v353_v0, %v336_v55  ;;  %v363_v9 = vadd.f32 %v362_v2, %v361_v58  ;;  %v513_v2 = vstv %s512_s7  ;;  %s1272_s7 = sadd.s32 7, %s2444_s13  ;;  %s1432_s13 = sshll.u32 %s2240_s22, 7 }
 0x122   : > { %vm514_vm4 = vcmp.eq.s32.totalorder %v513_v2, 1  ;;  %p1273_p7 = scmp.lt.s32.totalorder %s1272_s7, 16  ;;  %s1329_s22 = scalar_lea.sflag [#allocation3], %s209_s30 }
 0x123   : > { %v359_v13 = vadd.f32 %v358_v6, %v357_v1  ;;  %v2493_v15 = vsel %vm2482_vm2, %v363_v9, %v337_v36  ;;  %v245_v36 = vld [vmem:[%s2965_s2 + $0x5] sm:$0x1] }
 0x124   : > { %v2517_v39 = vsub.f32 1.0, %v245_v36  ;;  %v491_v3 = vmul.f32 %v2493_v15, %v2465_v51 }
 0x125   : > { %v364_v18 = vsub.f32 %v359_v13, %v2422_v30  ;;  %v2505_v21 = vsel %vm2482_vm2, %v359_v13, %v2385_v27 }
 0x126   : > { %v381_v41 = vmul.f32 %v2517_v39, %v2391_v28  ;;  %v465_v47 = vsub.f32 %v2505_v21, %v2422_v30 }
 0x127   : > { %v365_v22 = vmul.f32 %v364_v18, %v2498_v16 }
 0x128   : > { %v466_v55 = vmul.f32 %v465_v47, %v2430_v34  ;;  %v485_v56 = vmul.f32 %v465_v47, %v2435_v35 }
 0x129   : > { %v374_v24 = vsub.f32 %v365_v22, %v373_v19 }
 0x12a   : > { %v486_v61 = vadd.f32 %v485_v56, %v2422_v30 }
 0x12b   : > { %v2088_v25 = vpop.eup %2087  ;;  %v375_v29 = vmul.f32 %v374_v24, %v353_v0 }
 0x12c   : > { %v347_v31 = vadd.f32 1.0, %v2088_v25  ;;  %v487_v1 = vsub.f32 %v486_v61, %v2463_v50 }
 0x12d   : > { %v377_v32 = vrot.slane %v375_v29, 6 }
 0x12e   : > { %2089 = vrcp.f32 %v347_v31 }
 0x12f   : > { %v379_v33 = vadd.f32 %v377_v32, %v2385_v27 }
 0x131   : > { %v2515_v38 = vsel %vm2482_vm2, %v379_v33, %v2385_v27 }
 0x132   : > { %v471_v58 = vrot.slane %v2515_v38, 2  ;;  %v496_v6 = vsub.f32 %v2515_v38, %v2468_v54 }
 0x134   : > { %v473_v62 = vadd.f32 %v471_v58, %v2493_v15  ;;  %v498_v25 = vrot.slane %v496_v6, 2 }
 0x136   : > { %v500_v36 = vmul.f32 %v498_v25, %v2489_v12 }
 0x138   : > { %v2526_v42 = vpop.eup %2089 }
 0x139   : > { %v382_v43 = vmul.f32 %v2526_v42, %v2522_v40 }
 0x13b   : > { %v383_v44 = vadd.f32 %v382_v43, %v381_v41 }
 0x13d   : > { %v2533_v27 = vsel %vm2482_vm2, %v383_v44, %v2391_v28  ;;  %v392_v28 = vld [vmem:[%s2277_s11 + $0x1] sm:$0x1] }
 0x13e   : > { %1639 = vmatmul.mubr.f32.vlgmr.msra.gmra.mrb[0].mxu1 %v2533_v27  ;;  %v393_v45 = vmul.f32 0.85, %v392_v28 }
 0x13f   : > { %1925 = vmatpush3.bf16.msra.mxu1 %v2297_v5  ;;  %1708 = vmatprep.mubr.msk.f32.mxu1 %vm2186_vm0, %v2187_v7 }
 0x140   : > { %1926 = vmatprep.subr.bf16.mxu1 %v2185_v4 }
 0x143   : > { %1928 = vmatpush3.bf16.msra.mxu1 %v2308_v8 }
 0x144   : > { %1929 = vmatprep.subr.bf16.mxu1 %v2185_v4 }
 0x147   : > { %1931 = vmatpush3.bf16.msra.mxu1 %v2320_v11 }
 0x148   : > { %1932 = vmatprep.subr.bf16.mxu1 %v2185_v4 }
 0x14b   : > { %1934 = vmatpush3.bf16.msra.mxu1 %v2332_v14 }
 0x14c   : > { %1935 = vmatprep.subr.bf16.mxu1 %v2185_v4 }
 0x14f   : > { %1937 = vmatpush3.bf16.msra.mxu1 %v2344_v17 }
 0x150   : > { %1938 = vmatprep.subr.bf16.mxu1 %v2185_v4 }
 0x153   : > { %1940 = vmatpush3.bf16.msra.mxu1 %v2356_v20 }
 0x154   : > { %1941 = vmatprep.subr.bf16.mxu1 %v2185_v4 }
 0x157   : > { %1943 = vmatpush3.bf16.msra.mxu1 %v2368_v23 }
 0x158   : > { %1944 = vmatprep.subr.bf16.mxu1 %v2185_v4 }
 0x15b   : > { %1946 = vmatpush3.bf16.msra.mxu1 %v2380_v26 }
 0x15c   : > { %1971 = vmatprep.subr.bf16.mxu1 %v2185_v4 }
 0x211   : > { %v460_v48 = vpop.f32.mrb[0].mxu1 }
 0x212   : > { %v461_v49 = vadd.f32 %v460_v48, %v393_v45  ;;  %v1640_v52 = vpop.f32.mrb[1].mxu1 }
 0x214   : > { %v464_v53 = vmul.f32 %v461_v49, %v2441_v37 }
 0x216   : > { %v467_v59 = vsub.f32 %v464_v53, %v466_v55 }
 0x218   : > { %v468_v60 = vmul.f32 %v2454_v46, %v467_v59 }
 0x21a   : > { %v469_v63 = vadd.f32 %v468_v60, %v2505_v21 }
 0x21c   : > { %v474_v0 = vsub.f32 %v469_v63, %v473_v62  ;;  %vm481_vm3 = vcmp.ge.f32.partialorder %v469_v63, %v473_v62 }
 0x21d   : > { %v1418_v9 = vsel %vm481_vm3, 1.0, %v2187_v7 }
 0x21e   : > { %v1417_v10 = vmul.f32 -1.442695, %v474_v0  ;;  %v484_v13 = vsub.f32 1.0, %v1418_v9  ;;  %v488_v18 = vmul.f32 %v1418_v9, %v487_v1  ;;  %v492_v19 = vmul.f32 %v1418_v9, %v2475_v57 }
 0x220   : > { %2091 = vpow2.f32 %v1417_v10  ;;  %v489_v22 = vmul.f32 %v484_v13, %v469_v63  ;;  %v493_v24 = vadd.f32 %v492_v19, %v491_v3 }
 0x222   : > { %v490_v29 = vadd.f32 %v489_v22, %v488_v18  ;;  %v2575_v31 = vsel %vm514_vm4, %v493_v24, %v2493_v15  ;;  %v640_v18 = vstv %s639_s9 }
 0x223   : > { %v618_v19 = vmul.f32 %v2575_v31, %v2465_v51  ;;  %vm641_vm6 = vcmp.eq.s32.totalorder %v640_v18, 1 }
 0x224   : > { %v494_v32 = vsub.f32 %v490_v29, %v2422_v30  ;;  %v2580_v33 = vsel %vm514_vm4, %v490_v29, %v2505_v21  ;;  %v507_v21 = vmul.f32 %v2533_v27, %v2517_v39 }
 0x225   : > { %v592_v56 = vsub.f32 %v2580_v33, %v2422_v30 }
 0x226   : > { %v495_v41 = vmul.f32 %v494_v32, %v2498_v16 }
 0x227   : > { %v593_v62 = vmul.f32 %v592_v56, %v2430_v34  ;;  %v612_v63 = vmul.f32 %v592_v56, %v2435_v35 }
 0x228   : > { %v501_v43 = vsub.f32 %v495_v41, %v500_v36 }
 0x229   : > { %v613_v3 = vadd.f32 %v612_v63, %v2422_v30 }
 0x22a   : > { %v2092_v44 = vpop.eup %2091  ;;  %v502_v28 = vmul.f32 %v501_v43, %v484_v13 }
 0x22b   : > { %v478_v45 = vadd.f32 1.0, %v2092_v44  ;;  %v614_v13 = vsub.f32 %v613_v3, %v2463_v50 }
 0x22c   : > { %v504_v47 = vrot.slane %v502_v28, 6 }
 0x22d   : > { %2093 = vrcp.f32 %v478_v45 }
 0x22e   : > { %v506_v48 = vadd.f32 %v504_v47, %v2515_v38 }
 0x230   : > { %v2587_v15 = vsel %vm514_vm4, %v506_v48, %v2515_v38  ;;  %v519_v38 = vld [vmem:[%s2277_s11 + $0x2] sm:$0x1] }
 0x231   : > { %v598_v0 = vrot.slane %v2587_v15, 2  ;;  %v623_v22 = vsub.f32 %v2587_v15, %v2468_v54 }
 0x233   : > { %v600_v6 = vadd.f32 %v598_v0, %v2575_v31  ;;  %v625_v44 = vrot.slane %v623_v22, 2 }
 0x237   : > { %v2589_v49 = vpop.eup %2093 }
 0x238   : > { %v508_v52 = vmul.f32 %v2589_v49, %v2522_v40 }
 0x23a   : > { %v509_v53 = vadd.f32 %v508_v52, %v507_v21  ;;  %v627_v21 = vmul.f32 %v625_v44, %v2489_v12 }
 0x23c   : > { %v2597_v55 = vsel %vm514_vm4, %v509_v53, %v2533_v27  ;;  %v520_v27 = vmul.f32 0.85, %v519_v38  ;;  %vm1312_vm4 = vcmask 1045504  }
 0x23d   : > { %1674 = vmatmul.mubr.f32.vlgmr.msra.gmra.mrb[2].mxu0 %v2597_v55 }
 0x23e   : > { %1949 = vmatpush3.bf16.msra.mxu0 %v2297_v5  ;;  %1743 = vmatprep.mubr.msk.f32.mxu0 %vm2186_vm0, %v2187_v7 }
 0x23f   : > { %1950 = vmatprep.subr.bf16.mxu0 %v2185_v4 }
 0x242   : > { %1952 = vmatpush3.bf16.msra.mxu0 %v2308_v8 }
 0x243   : > { %1953 = vmatprep.subr.bf16.mxu0 %v2185_v4 }
 0x246   : > { %1955 = vmatpush3.bf16.msra.mxu0 %v2320_v11 }
 0x247   : > { %1956 = vmatprep.subr.bf16.mxu0 %v2185_v4 }
 0x24a   : > { %1958 = vmatpush3.bf16.msra.mxu0 %v2332_v14 }
 0x24b   : > { %1959 = vmatprep.subr.bf16.mxu0 %v2185_v4 }
 0x24e   : > { %1961 = vmatpush3.bf16.msra.mxu0 %v2344_v17 }
 0x24f   : > { %1962 = vmatprep.subr.bf16.mxu0 %v2185_v4 }
 0x252   : > { %1964 = vmatpush3.bf16.msra.mxu0 %v2356_v20 }
 0x253   : > { %1965 = vmatprep.subr.bf16.mxu0 %v2185_v4 }
 0x256   : > { %1967 = vmatpush3.bf16.msra.mxu0 %v2368_v23 }
 0x257   : > { %1968 = vmatprep.subr.bf16.mxu0 %v2185_v4 }
 0x25a   : > { %1970 = vmatpush3.bf16.msra.mxu0 %v2380_v26 }
 0x25b   : > { %1995 = vmatprep.subr.bf16.mxu0 %v2185_v4 }
 0x310   : > { %v587_v58 = vpop.f32.mrb[2].mxu0 }
 0x311   : > { %v588_v59 = vadd.f32 %v587_v58, %v520_v27  ;;  %v1675_v60 = vpop.f32.mrb[3].mxu0 }
 0x312   : > { %v1282_v60 = vrot.slane %v2589_v49, 7 }
 0x313   : > { %v591_v61 = vmul.f32 %v588_v59, %v2441_v37 }
 0x314   : > { %v1303_v0 = vsel %vm1302_vm7, %v2526_v42, %v1282_v60  ;;  %v646_v42 = vld [vmem:[%s2277_s11 + $0x3] sm:$0x1] }
 0x315   : > { %v594_v1 = vsub.f32 %v591_v61, %v593_v62  ;;  %v634_v61 = vmul.f32 %v2597_v55, %v2517_v39  ;;  %v647_v49 = vmul.f32 0.85, %v646_v42 }
 0x317   : > { %v595_v2 = vmul.f32 %v2454_v46, %v594_v1 }
 0x319   : > { %v596_v9 = vadd.f32 %v595_v2, %v2580_v33 }
 0x31b   : > { %v601_v10 = vsub.f32 %v596_v9, %v600_v6  ;;  %vm608_vm5 = vcmp.ge.f32.partialorder %v596_v9, %v600_v6 }
 0x31c   : > { %v1420_v24 = vsel %vm608_vm5, 1.0, %v2187_v7 }
 0x31d   : > { %v1419_v25 = vmul.f32 -1.442695, %v601_v10  ;;  %v611_v29 = vsub.f32 1.0, %v1420_v24  ;;  %v615_v32 = vmul.f32 %v1420_v24, %v614_v13  ;;  %v619_v36 = vmul.f32 %v1420_v24, %v2475_v57 }
 0x31f   : > { %2095 = vpow2.f32 %v1419_v25  ;;  %v616_v41 = vmul.f32 %v611_v29, %v596_v9  ;;  %v620_v43 = vadd.f32 %v619_v36, %v618_v19 }
 0x321   : > { %v617_v28 = vadd.f32 %v616_v41, %v615_v32  ;;  %v2639_v45 = vsel %vm641_vm6, %v620_v43, %v2575_v31  ;;  %v767_v43 = vstv %s766_s14 }
 0x322   : > { %v745_v44 = vmul.f32 %v2639_v45, %v2465_v51  ;;  %vm768_vm10 = vcmp.eq.s32.totalorder %v767_v43, 1 }
 0x323   : > { %v621_v47 = vsub.f32 %v617_v28, %v2422_v30  ;;  %v2644_v48 = vsel %vm641_vm6, %v617_v28, %v2580_v33 }
 0x325   : > { %v622_v52 = vmul.f32 %v621_v47, %v2498_v16 }
 0x327   : > { %v628_v53 = vsub.f32 %v622_v52, %v627_v21 }
 0x329   : > { %v2096_v38 = vpop.eup %2095  ;;  %v629_v27 = vmul.f32 %v628_v53, %v611_v29 }
 0x32a   : > { %v605_v56 = vadd.f32 1.0, %v2096_v38 }
 0x32b   : > { %v631_v58 = vrot.slane %v629_v27, 6 }
 0x32c   : > { %2097 = vrcp.f32 %v605_v56 }
 0x32d   : > { %v633_v59 = vadd.f32 %v631_v58, %v2587_v15 }
 0x32f   : > { %v2651_v31 = vsel %vm641_vm6, %v633_v59, %v2587_v15 }
 0x330   : > { %v725_v19 = vrot.slane %v2651_v31, 2  ;;  %v750_v28 = vsub.f32 %v2651_v31, %v2468_v54 }
 0x332   : > { %v727_v29 = vadd.f32 %v725_v19, %v2639_v45  ;;  %v752_v58 = vrot.slane %v750_v28, 2 }
 0x336   : > { %v2098_v33 = vpop.eup %2097 }
 0x337   : > { %v635_v62 = vmul.f32 %v2098_v33, %v2522_v40  ;;  %v1285_v63 = vrot.slane %v2098_v33, 6 }
 0x339   : > { %v636_v1 = vadd.f32 %v635_v62, %v634_v61  ;;  %v2660_v2 = vsel %vm1304_vm8, %v1303_v0, %v1285_v63  ;;  %v754_v62 = vmul.f32 %v752_v58, %v2489_v12 }
 0x33b   : > { %v2664_v15 = vsel %vm641_vm6, %v636_v1, %v2597_v55  ;;  %v719_v55 = vsub.f32 %v2644_v48, %v2422_v30 }
 0x33c   : > { %1709 = vmatmul.mubr.f32.vlgmr.msra.gmra.mrb[2].mxu1 %v2664_v15 }
 0x33d   : > { %1973 = vmatpush3.bf16.msra.mxu1 %v2297_v5  ;;  %1778 = vmatprep.mubr.msk.f32.mxu1 %vm2186_vm0, %v2187_v7  ;;  %v720_v13 = vmul.f32 %v719_v55, %v2430_v34  ;;  %v739_v18 = vmul.f32 %v719_v55, %v2435_v35 }
 0x33e   : > { %1974 = vmatprep.subr.bf16.mxu1 %v2185_v4 }
 0x33f   : > { %v740_v25 = vadd.f32 %v739_v18, %v2422_v30 }
 0x341   : > { %1976 = vmatpush3.bf16.msra.mxu1 %v2308_v8  ;;  %v741_v41 = vsub.f32 %v740_v25, %v2463_v50 }
 0x342   : > { %1977 = vmatprep.subr.bf16.mxu1 %v2185_v4 }
 0x345   : > { %1979 = vmatpush3.bf16.msra.mxu1 %v2320_v11 }
 0x346   : > { %1980 = vmatprep.subr.bf16.mxu1 %v2185_v4 }
 0x349   : > { %1982 = vmatpush3.bf16.msra.mxu1 %v2332_v14 }
 0x34a   : > { %1983 = vmatprep.subr.bf16.mxu1 %v2185_v4 }
 0x34d   : > { %1985 = vmatpush3.bf16.msra.mxu1 %v2344_v17 }
 0x34e   : > { %1986 = vmatprep.subr.bf16.mxu1 %v2185_v4 }
 0x351   : > { %1988 = vmatpush3.bf16.msra.mxu1 %v2356_v20 }
 0x352   : > { %1989 = vmatprep.subr.bf16.mxu1 %v2185_v4 }
 0x355   : > { %1991 = vmatpush3.bf16.msra.mxu1 %v2368_v23 }
 0x356   : > { %1992 = vmatprep.subr.bf16.mxu1 %v2185_v4 }
 0x359   : > { %1994 = vmatpush3.bf16.msra.mxu1 %v2380_v26 }
 0x35a   : > { %2019 = vmatprep.subr.bf16.mxu1 %v2185_v4 }
 0x40f   : > { %v714_v3 = vpop.f32.mrb[2].mxu1 }
 0x410   : > { %v715_v6 = vadd.f32 %v714_v3, %v647_v49  ;;  %v1710_v9 = vpop.f32.mrb[3].mxu1 }
 0x412   : > { %v718_v10 = vmul.f32 %v715_v6, %v2441_v37 }
 0x414   : > { %v721_v22 = vsub.f32 %v718_v10, %v720_v13 }
 0x416   : > { %v722_v24 = vmul.f32 %v2454_v46, %v721_v22 }
 0x418   : > { %v723_v32 = vadd.f32 %v722_v24, %v2644_v48 }
 0x41a   : > { %v728_v36 = vsub.f32 %v723_v32, %v727_v29  ;;  %vm735_vm9 = vcmp.ge.f32.partialorder %v723_v32, %v727_v29 }
 0x41b   : > { %v1422_v47 = vsel %vm735_vm9, 1.0, %v2187_v7 }
 0x41c   : > { %v1421_v21 = vmul.f32 -1.442695, %v728_v36  ;;  %v738_v52 = vsub.f32 1.0, %v1422_v47  ;;  %v742_v53 = vmul.f32 %v1422_v47, %v741_v41  ;;  %v746_v38 = vmul.f32 %v1422_v47, %v2475_v57 }
 0x41e   : > { %2099 = vpow2.f32 %v1421_v21  ;;  %v743_v27 = vmul.f32 %v738_v52, %v723_v32  ;;  %v747_v56 = vadd.f32 %v746_v38, %v745_v44  ;;  %v894_v38 = vstv %s893_s16  ;;  %s2906_s16 = scalar_lea.hbm %s2967_s4, %s1432_s13 }
 0x41f   : > { %vm895_vm13 = vcmp.eq.s32.totalorder %v894_v38, 1 }
 0x420   : > { %v744_v59 = vadd.f32 %v743_v27, %v742_v53  ;;  %v2706_v60 = vsel %vm768_vm10, %v747_v56, %v2639_v45 }
 0x421   : > { %v872_v27 = vmul.f32 %v2706_v60, %v2465_v51 }
 0x422   : > { %v748_v33 = vsub.f32 %v744_v59, %v2422_v30  ;;  %v2711_v61 = vsel %vm768_vm10, %v744_v59, %v2644_v48  ;;  %v761_v48 = vmul.f32 %v2664_v15, %v2517_v39 }
 0x424   : > { %v749_v63 = vmul.f32 %v748_v33, %v2498_v16 }
 0x426   : > { %v755_v0 = vsub.f32 %v749_v63, %v754_v62 }
 0x428   : > { %v2100_v1 = vpop.eup %2099  ;;  %v756_v42 = vmul.f32 %v755_v0, %v738_v52 }
 0x429   : > { %v732_v49 = vadd.f32 1.0, %v2100_v1 }
 0x42a   : > { %v758_v55 = vrot.slane %v756_v42, 6 }
 0x42b   : > { %2101 = vrcp.f32 %v732_v49 }
 0x42c   : > { %v760_v3 = vadd.f32 %v758_v55, %v2651_v31 }
 0x42e   : > { %v2718_v45 = vsel %vm768_vm10, %v760_v3, %v2651_v31  ;;  %v773_v31 = vld [vmem:[%s2277_s11 + $0x4] sm:$0x1] }
 0x42f   : > { %v852_v41 = vrot.slane %v2718_v45, 2  ;;  %v877_v56 = vsub.f32 %v2718_v45, %v2468_v54 }
 0x431   : > { %v854_v47 = vadd.f32 %v852_v41, %v2706_v60  ;;  %v879_v42 = vrot.slane %v877_v56, 2 }
 0x435   : > { %v2102_v6 = vpop.eup %2101 }
 0x436   : > { %v762_v9 = vmul.f32 %v2102_v6, %v2522_v40  ;;  %v1288_v10 = vrot.slane %v2102_v6, 5 }
 0x438   : > { %v763_v13 = vadd.f32 %v762_v9, %v761_v48  ;;  %v2725_v18 = vsel %vm1306_vm11, %v2660_v2, %v1288_v10  ;;  %v774_v2 = vmul.f32 0.85, %v773_v31  ;;  %v881_v48 = vmul.f32 %v879_v42, %v2489_v12 }
 0x43a   : > { %v2729_v19 = vsel %vm768_vm10, %v763_v13, %v2664_v15  ;;  %v846_v15 = vsub.f32 %v2711_v61, %v2422_v30 }
 0x43b   : > { %1744 = vmatmul.mubr.f32.vlgmr.msra.gmra.mrb[4].mxu0 %v2729_v19 }
 0x43c   : > { %1997 = vmatpush3.bf16.msra.mxu0 %v2297_v5  ;;  %1813 = vmatprep.mubr.msk.f32.mxu0 %vm2186_vm0, %v2187_v7  ;;  %v847_v32 = vmul.f32 %v846_v15, %v2430_v34  ;;  %v866_v36 = vmul.f32 %v846_v15, %v2435_v35 }
 0x43d   : > { %1998 = vmatprep.subr.bf16.mxu0 %v2185_v4 }
 0x43e   : > { %v867_v28 = vadd.f32 %v866_v36, %v2422_v30 }
 0x440   : > { %2000 = vmatpush3.bf16.msra.mxu0 %v2308_v8  ;;  %v868_v53 = vsub.f32 %v867_v28, %v2463_v50 }
 0x441   : > { %2001 = vmatprep.subr.bf16.mxu0 %v2185_v4 }
 0x444   : > { %2003 = vmatpush3.bf16.msra.mxu0 %v2320_v11 }
 0x445   : > { %2004 = vmatprep.subr.bf16.mxu0 %v2185_v4 }
 0x448   : > { %2006 = vmatpush3.bf16.msra.mxu0 %v2332_v14 }
 0x449   : > { %2007 = vmatprep.subr.bf16.mxu0 %v2185_v4 }
 0x44c   : > { %2009 = vmatpush3.bf16.msra.mxu0 %v2344_v17 }
 0x44d   : > { %2010 = vmatprep.subr.bf16.mxu0 %v2185_v4 }
 0x450   : > { %2012 = vmatpush3.bf16.msra.mxu0 %v2356_v20 }
 0x451   : > { %2013 = vmatprep.subr.bf16.mxu0 %v2185_v4 }
 0x454   : > { %2015 = vmatpush3.bf16.msra.mxu0 %v2368_v23 }
 0x455   : > { %2016 = vmatprep.subr.bf16.mxu0 %v2185_v4 }
 0x458   : > { %2018 = vmatpush3.bf16.msra.mxu0 %v2380_v26 }
 0x50e   : > { %v841_v22 = vpop.f32.mrb[4].mxu0 }
 0x50f   : > { %v842_v24 = vadd.f32 %v841_v22, %v774_v2  ;;  %v1745_v25 = vpop.f32.mrb[5].mxu0 }
 0x511   : > { %v845_v29 = vmul.f32 %v842_v24, %v2441_v37 }
 0x513   : > { %v848_v43 = vsub.f32 %v845_v29, %v847_v32 }
 0x515   : > { %v849_v44 = vmul.f32 %v2454_v46, %v848_v43 }
 0x517   : > { %v850_v21 = vadd.f32 %v849_v44, %v2711_v61 }
 0x519   : > { %v855_v52 = vsub.f32 %v850_v21, %v854_v47  ;;  %vm862_vm12 = vcmp.ge.f32.partialorder %v850_v21, %v854_v47 }
 0x51a   : > { %v1424_v58 = vsel %vm862_vm12, 1.0, %v2187_v7 }
 0x51b   : > { %v1423_v59 = vmul.f32 -1.442695, %v855_v52  ;;  %v865_v33 = vsub.f32 1.0, %v1424_v58  ;;  %v869_v62 = vmul.f32 %v1424_v58, %v868_v53  ;;  %v873_v63 = vmul.f32 %v1424_v58, %v2475_v57 }
 0x51c   : > { %v1021_v52 = vstv %s1020_s23  ;;  %s2188_s23 = smov [#allocation2]  }
 0x51d   : > { %2103 = vpow2.f32 %v1423_v59  ;;  %v870_v0 = vmul.f32 %v865_v33, %v850_v21  ;;  %v874_v1 = vadd.f32 %v873_v63, %v872_v27  ;;  %s2125_s25 = sshll.u32 %s2188_s23, 4  ;;  %s2126_s25 = int_to_ptr.vmem [resolvable:$false] %s2125_s25 }
 0x51e   : > { %p2128_p11 = scmp.lt.s32.totalorder %s2908_s10, %s2126_s25 }
 0x51f   : > { %v871_v49 = vadd.f32 %v870_v0, %v869_v62  ;;  %v2770_v55 = vsel %vm895_vm13, %v874_v1, %v2706_v60 }
 0x520   : > { %v999_v53 = vmul.f32 %v2770_v55, %v2465_v51 }
 0x521   : > { %v875_v3 = vsub.f32 %v871_v49, %v2422_v30  ;;  %v2775_v6 = vsel %vm895_vm13, %v871_v49, %v2711_v61  ;;  %v888_v61 = vmul.f32 %v2729_v19, %v2517_v39 }
 0x523   : > { %v876_v9 = vmul.f32 %v875_v3, %v2498_v16 }
 0x525   : > { %v882_v10 = vsub.f32 %v876_v9, %v881_v48 }
 0x527   : > { %v2104_v13 = vpop.eup %2103  ;;  %v883_v31 = vmul.f32 %v882_v10, %v865_v33 }
 0x528   : > { %v859_v2 = vadd.f32 1.0, %v2104_v13 }
 0x529   : > { %v885_v15 = vrot.slane %v883_v31, 6 }
 0x52a   : > { %2105 = vrcp.f32 %v859_v2 }
 0x52b   : > { %v887_v22 = vadd.f32 %v885_v15, %v2718_v45 }
 0x52d   : > { %v2782_v60 = vsel %vm895_vm13, %v887_v22, %v2718_v45 }
 0x52e   : > { %v1004_v38 = vsub.f32 %v2782_v60, %v2468_v54 }
 0x530   : > { %v1006_v0 = vrot.slane %v1004_v38, 2 }
 0x532   : > { %v1008_v48 = vmul.f32 %v1006_v0, %v2489_v12 }
 0x534   : > { %v2106_v24 = vpop.eup %2105 }
 0x535   : > { %v889_v25 = vmul.f32 %v2106_v24, %v2522_v40  ;;  %v1291_v29 = vrot.slane %v2106_v24, 4 }
 0x537   : > { %v890_v32 = vadd.f32 %v889_v25, %v888_v61  ;;  %v2789_v36 = vsel %vm1308_vm14, %v2725_v18, %v1291_v29 }
 0x539   : > { %v2793_v41 = vsel %vm895_vm13, %v890_v32, %v2729_v19 }
 0x53a   : > { %1779 = vmatmul.mubr.f32.vlgmr.msra.gmra.mrb[4].mxu1 %v2793_v41 }
 0x53b   : > { %2021 = vmatpush3.bf16.msra.mxu1 %v2297_v5  ;;  %1848 = vmatprep.mubr.msk.f32.mxu1 %vm2186_vm0, %v2187_v7  ;;  %v900_v5 = vld [vmem:[%s2277_s11 + $0x5] sm:$0x1]  ;;  %vm1022_vm0 = vcmp.eq.s32.totalorder %v1021_v52, 1 }
 0x53c   : > { %2022 = vmatprep.subr.bf16.mxu1 %v2185_v4 }
 0x53f   : > { %2024 = vmatpush3.bf16.msra.mxu1 %v2308_v8  ;;  %v901_v8 = vmul.f32 0.85, %v900_v5 }
 0x540   : > { %2025 = vmatprep.subr.bf16.mxu1 %v2185_v4 }
 0x543   : > { %2027 = vmatpush3.bf16.msra.mxu1 %v2320_v11  ;;  %v973_v11 = vsub.f32 %v2775_v6, %v2422_v30 }
 0x544   : > { %2028 = vmatprep.subr.bf16.mxu1 %v2185_v4 }
 0x545   : > { %v993_v19 = vmul.f32 %v973_v11, %v2435_v35 }
 0x547   : > { %2030 = vmatpush3.bf16.msra.mxu1 %v2332_v14  ;;  %v994_v43 = vadd.f32 %v993_v19, %v2422_v30 }
 0x548   : > { %2031 = vmatprep.subr.bf16.mxu1 %v2185_v4 }
 0x549   : > { %v995_v21 = vsub.f32 %v994_v43, %v2463_v50 }
 0x54b   : > { %2033 = vmatpush3.bf16.msra.mxu1 %v2344_v17 }
 0x54c   : > { %2034 = vmatprep.subr.bf16.mxu1 %v2185_v4 }
 0x54f   : > { %2036 = vmatpush3.bf16.msra.mxu1 %v2356_v20  ;;  %v974_v20 = vmul.f32 %v973_v11, %v2430_v34 }
 0x550   : > { %2037 = vmatprep.subr.bf16.mxu1 %v2185_v4 }
 0x553   : > { %2039 = vmatpush3.bf16.msra.mxu1 %v2368_v23 }
 0x554   : > { %2040 = vmatprep.subr.bf16.mxu1 %v2185_v4  ;;  %v979_v4 = vrot.slane %v2782_v60, 2 }
 0x556   : > { %v981_v44 = vadd.f32 %v979_v4, %v2770_v55 }
 0x557   : > { %2042 = vmatpush3.bf16.msra.mxu1 %v2380_v26 }
 0x60d   : > { %v968_v14 = vpop.f32.mrb[4].mxu1 }
 0x60e   : > { %v969_v17 = vadd.f32 %v968_v14, %v901_v8  ;;  %v1780_v45 = vpop.f32.mrb[5].mxu1  ;;  %v1027_v8 = vld [vmem:[%s2277_s11 + $0x6] sm:$0x1] }
 0x60f   : > { %v1028_v11 = vmul.f32 0.85, %v1027_v8 }
 0x610   : > { %v972_v18 = vmul.f32 %v969_v17, %v2441_v37 }
 0x612   : > { %v975_v23 = vsub.f32 %v972_v18, %v974_v20 }
 0x614   : > { %v976_v26 = vmul.f32 %v2454_v46, %v975_v23 }
 0x616   : > { %v977_v28 = vadd.f32 %v976_v26, %v2775_v6 }
 0x618   : > { %v982_v47 = vsub.f32 %v977_v28, %v981_v44  ;;  %vm989_vm15 = vcmp.ge.f32.partialorder %v977_v28, %v981_v44 }
 0x619   : > { %v1426_v27 = vsel %vm989_vm15, 1.0, %v2187_v7 }
 0x61a   : > { %v1425_v56 = vmul.f32 -1.442695, %v982_v47  ;;  %v992_v58 = vsub.f32 1.0, %v1426_v27  ;;  %v996_v59 = vmul.f32 %v1426_v27, %v995_v21  ;;  %v1000_v33 = vmul.f32 %v1426_v27, %v2475_v57 }
 0x61b   : > { %v1148_v47 = vstv %s1147_s26  ;;  %s2127_s26 = scalar_lea.vmem %s2126_s25, 256 }
 0x61c   : > { %2107 = vpow2.f32 %v1425_v56  ;;  %v997_v62 = vmul.f32 %v992_v58, %v977_v28  ;;  %v1001_v63 = vadd.f32 %v1000_v33, %v999_v53  ;;  %vm1149_vm3 = vcmp.eq.s32.totalorder %v1148_v47, 1  ;;  %p2129_p12 = scmp.lt.s32.totalorder %s2127_s26, %s2121_s17 }
 0x61e   : > { %v998_v1 = vadd.f32 %v997_v62, %v996_v59  ;;  %v1024_v42 = vsel %vm1022_vm0, %v1001_v63, %v2770_v55  ;;  %p2130_p13 = por %p2129_p12, %p2128_p11 }
 0x61f   : > { %v1126_v21 = vmul.f32 %v1024_v42, %v2465_v51 }
 0x620   : > { %v1002_v49 = vsub.f32 %v998_v1, %v2422_v30  ;;  %v1023_v3 = vsel %vm1022_vm0, %v998_v1, %v2775_v6  ;;  %v1015_v6 = vmul.f32 %v2793_v41, %v2517_v39  ;;  %p2131_p0 = pnand %p2130_p13, %p2124_p10 }
 0x621   : > { %v1100_v14 = vsub.f32 %v1023_v3, %v2422_v30 }
 0x622   : > { %v1003_v9 = vmul.f32 %v1002_v49, %v2498_v16 }
 0x623   : > { %v1101_v20 = vmul.f32 %v1100_v14, %v2430_v34  ;;  %v1120_v19 = vmul.f32 %v1100_v14, %v2435_v35 }
 0x624   : > { %v1009_v10 = vsub.f32 %v1003_v9, %v1008_v48 }
 0x625   : > { %v1121_v23 = vadd.f32 %v1120_v19, %v2422_v30 }
 0x626   : > { %v2108_v13 = vpop.eup %2107  ;;  %v1010_v31 = vmul.f32 %v1009_v10, %v992_v58 }
 0x627   : > { %v986_v2 = vadd.f32 1.0, %v2108_v13  ;;  %v1122_v28 = vsub.f32 %v1121_v23, %v2463_v50 }
 0x628   : > { %v1012_v15 = vrot.slane %v1010_v31, 6 }
 0x629   : > { %2109 = vrcp.f32 %v986_v2 }
 0x62a   : > { %v1014_v22 = vadd.f32 %v1012_v15, %v2782_v60 }
 0x62c   : > { %v1025_v55 = vsel %vm1022_vm0, %v1014_v22, %v2782_v60 }
 0x62d   : > { %v1131_v52 = vsub.f32 %v1025_v55, %v2468_v54 }
 0x62f   : > { %v1133_v62 = vrot.slane %v1131_v52, 2 }
 0x631   : > { %v1135_v48 = vmul.f32 %v1133_v62, %v2489_v12 }
 0x633   : > { %v2110_v24 = vpop.eup %2109 }
 0x634   : > { %v1016_v61 = vmul.f32 %v2110_v24, %v2522_v40  ;;  %v1294_v25 = vrot.slane %v2110_v24, 3 }
 0x636   : > { %v1017_v29 = vadd.f32 %v1016_v61, %v1015_v6  ;;  %v1311_v32 = vsel %vm1310_vm1, %v2789_v36, %v1294_v25  ;;  %v1106_v36 = vrot.slane %v1025_v55, 2 }
 0x638   : > { %v1026_v5 = vsel %vm1022_vm0, %v1017_v29, %v2793_v41  ;;  %v1108_v26 = vadd.f32 %v1106_v36, %v1024_v42 }
 0x639   : > { %1814 = vmatmul.mubr.f32.vlgmr.msra.gmra.mrb[6].mxu0 %v1026_v5 }
 0x70c   : > { %v1095_v60 = vpop.f32.mrb[6].mxu0 }
 0x70d   : > { %v1096_v17 = vadd.f32 %v1095_v60, %v1028_v11  ;;  %v1815_v45 = vpop.f32.mrb[7].mxu0  ;;  %v1154_v60 = vld [vmem:[%s2277_s11 + $0x7] sm:$0x1]  ;;  %s1274_s11 = scalar_select %p1273_p7, 1, 0 }
 0x70f   : > { %v1099_v18 = vmul.f32 %v1096_v17, %v2441_v37 }
 0x711   : > { %v1102_v4 = vsub.f32 %v1099_v18, %v1101_v20 }
 0x713   : > { %v1103_v41 = vmul.f32 %v2454_v46, %v1102_v4 }
 0x715   : > { %v1104_v43 = vadd.f32 %v1103_v41, %v1023_v3  ;;  %v2119_v41 = vld [vmem:[%s2965_s2] sm:$0x1] }
 0x717   : > { %v1109_v44 = vsub.f32 %v1104_v43, %v1108_v26  ;;  %vm1116_vm2 = vcmp.ge.f32.partialorder %v1104_v43, %v1108_v26 }
 0x718   : > { %v1428_v53 = vsel %vm1116_vm2, 1.0, %v2187_v7 }
 0x719   : > { %v1427_v38 = vmul.f32 -1.442695, %v1109_v44  ;;  %v1119_v27 = vsub.f32 1.0, %v1428_v53  ;;  %v1123_v56 = vmul.f32 %v1428_v53, %v1122_v28  ;;  %v1127_v58 = vmul.f32 %v1428_v53, %v2475_v57 }
 0x71b   : > { %2111 = vpow2.f32 %v1427_v38  ;;  %v1124_v59 = vmul.f32 %v1119_v27, %v1104_v43  ;;  %v1128_v33 = vadd.f32 %v1127_v58, %v1126_v21 }
 0x71d   : > { %v1125_v63 = vadd.f32 %v1124_v59, %v1123_v56  ;;  %v1151_v0 = vsel %vm1149_vm3, %v1128_v33, %v1024_v42 }
 0x71f   : > { %v1129_v1 = vsub.f32 %v1125_v63, %v2422_v30  ;;  %v1150_v49 = vsel %vm1149_vm3, %v1125_v63, %v1023_v3  ;;  %v1142_v3 = vmul.f32 %v1026_v5, %v2517_v39 }
 0x720   : > { %v1227_v17 = vsub.f32 %v1150_v49, %v2422_v30 }
 0x721   : > { %v1130_v9 = vmul.f32 %v1129_v1, %v2498_v16 }
 0x722   : > { %v1228_v36 = vmul.f32 %v1227_v17, %v2430_v34  ;;  %v1253_v34 = vmul.f32 %v1151_v0, %v2465_v51 }
 0x723   : > { %v1136_v10 = vsub.f32 %v1130_v9, %v1135_v48 }
 0x725   : > { %v2112_v13 = vpop.eup %2111  ;;  %v1137_v31 = vmul.f32 %v1136_v10, %v1119_v27 }
 0x726   : > { %v1113_v2 = vadd.f32 1.0, %v2112_v13 }
 0x727   : > { %v1139_v15 = vrot.slane %v1137_v31, 6 }
 0x728   : > { %2113 = vrcp.f32 %v1113_v2 }
 0x729   : > { %v1141_v22 = vadd.f32 %v1139_v15, %v1025_v55 }
 0x72b   : > { %v1152_v24 = vsel %vm1149_vm3, %v1141_v22, %v1025_v55  ;;  %v1155_v55 = vmul.f32 0.85, %v1154_v60 }
 0x72c   : > { %v1233_v42 = vrot.slane %v1152_v24, 2 }
 0x72e   : > { %v1235_v6 = vadd.f32 %v1233_v42, %v1151_v0 }
 0x732   : > { %v2114_v61 = vpop.eup %2113 }
 0x733   : > { %v1143_v25 = vmul.f32 %v2114_v61, %v2522_v40  ;;  %v1297_v29 = vrot.slane %v2114_v61, 2 }
 0x735   : > { %v1144_v8 = vadd.f32 %v1143_v25, %v1142_v3  ;;  %v2869_v11 = vsel %vm1312_vm4, %v1311_v32, %v1297_v29  ;;  %v1247_v32 = vmul.f32 %v1227_v17, %v2435_v35  ;;  %v1258_v35 = vsub.f32 %v1152_v24, %v2468_v54 }
 0x737   : > { %v2872_v14 = vsel %vm1149_vm3, %v1144_v8, %v1026_v5  ;;  %v1248_v23 = vadd.f32 %v2119_v41, %v1247_v32  ;;  %v1260_v38 = vrot.slane %v1258_v35, 2 }
 0x738   : > { %1849 = vmatmul.mubr.f32.vlgmr.msra.gmra.mrb[6].mxu1 %v2872_v14 }
 0x739   : > { %v1249_v43 = vsub.f32 %v1248_v23, %v2463_v50  ;;  %v1262_v58 = vmul.f32 %v1260_v38, %v2489_v12 }
 0x80b   : > { %v1222_v45 = vpop.f32.mrb[6].mxu1 }
 0x80c   : > { %v1223_v18 = vadd.f32 %v1222_v45, %v1155_v55  ;;  %v1850_v20 = vpop.f32.mrb[7].mxu1 }
 0x80e   : > { %v1226_v19 = vmul.f32 %v1223_v18, %v2441_v37  ;;  %v1275_v37 = vstv %s1274_s11 }
 0x80f   : > { %vm1276_vm6 = vcmp.eq.s32.totalorder %v1275_v37, 1 }
 0x810   : > { %v1229_v4 = vsub.f32 %v1226_v19, %v1228_v36 }
 0x812   : > { %v1230_v5 = vmul.f32 %v2454_v46, %v1229_v4 }
 0x814   : > { %v1231_v30 = vadd.f32 %v1230_v5, %v1150_v49 }
 0x816   : > { %v1236_v26 = vsub.f32 %v1231_v30, %v1235_v6  ;;  %vm1243_vm5 = vcmp.ge.f32.partialorder %v1231_v30, %v1235_v6 }
 0x817   : > { %v1430_v44 = vsel %vm1243_vm5, 1.0, %v2187_v7 }
 0x818   : > { %v1429_v28 = vmul.f32 -1.442695, %v1236_v26  ;;  %v1246_v46 = vsub.f32 1.0, %v1430_v44  ;;  %v1250_v47 = vmul.f32 %v1430_v44, %v1249_v43  ;;  %v1254_v21 = vmul.f32 %v1430_v44, %v2475_v57 }
 0x81a   : > { %2115 = vpow2.f32 %v1429_v28  ;;  %v1251_v52 = vmul.f32 %v1246_v46, %v1231_v30  ;;  %v1255_v53 = vadd.f32 %v1254_v21, %v1253_v34 }
 0x81c   : > { %v1252_v27 = vadd.f32 %v1251_v52, %v1250_v47  ;;  %v1278_v50 = vsel %vm1276_vm6, %v1255_v53, %v1151_v0 }
 0x81d   : > { %v1318_v56 = vrot.slane %v1278_v50, 7 }
 0x81e   : > { %v1256_v51 = vsub.f32 %v1252_v27, %v2119_v41  ;;  %v1277_v54 = vsel %vm1276_vm6, %v1252_v27, %v1150_v49 }
 0x81f   : > { %v1323_v7 = vsel %vm1302_vm7, %v1277_v54, %v1318_v56  ;;  %vm1314_vm7 = vcmask 1046528  }
 0x820   : > { %v1257_v57 = vmul.f32 %v1256_v51, %v2498_v16  ;;  %v1269_v16 = vmul.f32 %v2872_v14, %v2517_v39 }
 0x822   : > { %v1263_v59 = vsub.f32 %v1257_v57, %v1262_v58 }
 0x824   : > { %v2116_v33 = vpop.eup %2115  ;;  %v1264_v62 = vmul.f32 %v1263_v59, %v1246_v46 }
 0x825   : > { %v1240_v63 = vadd.f32 1.0, %v2116_v33 }
 0x826   : > { %v1266_v1 = vrot.slane %v1264_v62, 6 }
 0x827   : > { %2117 = vrcp.f32 %v1240_v63 }
 0x828   : > { %v1268_v0 = vadd.f32 %v1266_v1, %v1152_v24 }
 0x82a   : > { %v1279_v48 = vsel %vm1276_vm6, %v1268_v0, %v1152_v24 }
 0x82b   : > { %v1324_v9 = vsel %vm1304_vm8, %v1323_v7, %v1279_v48 }
 0x831   : > { %v2118_v12 = vpop.eup %2117 }
 0x832   : > { %v1270_v49 = vmul.f32 %v2118_v12, %v2522_v40  ;;  %v1300_v10 = vrot.slane %v2118_v12, 1 }
 0x834   : > { %v1271_v13 = vadd.f32 %v1270_v49, %v1269_v16  ;;  %v1315_v31 = vsel %vm1314_vm7, %v2869_v11, %v1300_v10 }
 0x835   : > { %1316 = vst [vmem:[%s211_s12] sm:$0xff] %v1315_v31 }
 0x836   : > { %v1280_v39 = vsel %vm1276_vm6, %v1271_v13, %v2872_v14 }
 0x837   : > { %2134 = shalt.err (!%p2131_p0)
}
 0x838   : > { %s2135_s30 = scalar_lea.hbm %s2906_s16, 128  ;;  %s2139_s7 = scalar_lea.hbm %s2967_s4, 256 }
 0x839   : > { %p2136_p1 = scmp.ne.s32.totalorder %s2906_s16, %s2135_s30  ;;  %p2140_p4 = scmp.lt.u32.totalorder %s2906_s16, %s2967_s4 }
 0x83a   : > { %p2141_p7 = scmp.lt.u32.totalorder %s2139_s7, %s2135_s30  ;;  %p2143_p9 = scmp.lt.u32.totalorder %s2135_s30, %s2906_s16 }
 0x83b   : > { %p2137_p2 = pnand %p2136_p1, %p2257_p5 }
 0x83c   : > { %p2142_p8 = por %p2141_p7, %p2140_p4 }
 0x83d   : > { %p2138_p3 = pneg %p2137_p2 }
 0x83e   : > { %p2144_p10 = por %p2143_p9, %p2142_p8 }
 0x840   : > { %p2145_p11 = pnand %p2144_p10, %p2138_p3 }
 0x842   : > { %2148 = shalt.err (!%p2145_p11)
}
 0x843   : > { %2043 = dma.vmem_to_hbm [thread:$0]  (%p2257_p5), %s2908_s10, 128, %s2906_s16, %s1329_s22   ;;  %v1321_v40 = vrot.slane %v1280_v39, 5  ;;  %v2120_v15 = vld [vmem:[%s2968_s5] sm:$0xff] }
 0x845   : > { %v1325_v2 = vsel %vm1306_vm11, %v1324_v9, %v1321_v40 }
 0x846   : > { %v1326_v22 = vsel %vm1308_vm14, %v1325_v2, %v2120_v15 }
 0x847   : > { %1327 = vst [vmem:[%s2968_s5] sm:$0xff] %v1326_v22 }
 0x848 PF: > { %p2049_p12 = scmp.ge.s32.totalorder %s2183_s21, 2  ;;  %s1360_s28 = sand.u32 1, %s2171_s18  }
 0x849   : > { %s1361_s10 = scalar_lea.sflag [#allocation3], %s1360_s28 }
 0x84a   : > { %p2046_p5 = pnand %p2049_p12, %p2261_p6 }
 0x84c   : > { %2166 = dma.done.wait (!%p2046_p5), %s1361_s10, 128  }
 0x84d   : > { %2168 = vsyncadd (!%p2046_p5), %s1361_s10, 4294967168  ;;  %p16_p13 = scmp.ge.s32.totalorder %s2244_s24, 4   ;;  %s2973_s18 = smov %s2175_s19 }
 0x84e   : > { %s2974_s19 = smov %s2179_s20  ;;  %s2975_s20 = smov %s2255_s27 }
 0x84f   : > { %s2976_s21 = smov %s2244_s24  ;;  %18 = sbr.rel (!%p16_p13) target bundleno = 3 (0x3), region = 83 }
 0x856   :  { %1366 = vsyncpa [#allocation3], 1 }
 0x857   :  { %1368 = vsyncpa [#allocation3 + $0x1], 1 }

</bundles_post_ra>
